<compile_context>
chip_gen: v5e
topology: v5e:2x2
jax: 0.10.0
libtpu: 0.0.40
codegen_flags: <defaults>
</compile_context>

<pallas_src>
import numpy as np
import jax
import jax.numpy as jnp
from jax.experimental import pallas as pl
from jax.experimental.pallas import tpu as pltpu


def _round_up(x, m):
    return (x + m - 1) // m * m


def _bf16_split3_cols(w):
    """Split a float32 table into 3 bf16 terms (sum reconstructs ~2^-27 rel),
    concatenated along the output axis -> (V, 3*H) bf16."""
    w = w.astype(jnp.float32)
    hi = w.astype(jnp.bfloat16)
    r1 = w - hi.astype(jnp.float32)
    mid = r1.astype(jnp.bfloat16)
    lo = (r1 - mid.astype(jnp.float32)).astype(jnp.bfloat16)
    return jnp.concatenate([hi, mid, lo], axis=1)


def _embed_kernel(idx_ref, day_ref, week_ref, out_ref):
    # idx_ref : (Mt, 4) int32   cols: [daytime_h, weekday_h, daytime_p, weekday_p]
    # day_ref : (Vd, 3H) bf16   split daytime table (hi|mid|lo), VMEM-resident
    # week_ref: (Vw, H)  f32    weekday table (exact), VMEM-resident
    # out_ref : (Mt, 4H) f32    [day_th | wk_th | day_tp | wk_tp]
    idx = idx_ref[...]
    mt = idx.shape[0]
    vd = day_ref.shape[0]
    vw = week_ref.shape[0]
    h = week_ref.shape[1]

    # ---- daytime gathers (cols 0 and 2) fused into ONE MXU matmul ----
    ids_day = jnp.concatenate([idx[:, 0:1], idx[:, 2:3]], axis=0)        # (2Mt, 1)
    iota = jax.lax.broadcasted_iota(jnp.int32, (2 * mt, vd), 1)          # built once
    onehot = (ids_day == iota).astype(jnp.bfloat16)                      # (2Mt, Vd) exact
    terms = jnp.dot(onehot, day_ref[...],
                    preferred_element_type=jnp.float32)                  # (2Mt, 3H) f32
    day = terms[:, :h] + terms[:, h:2 * h] + terms[:, 2 * h:3 * h]       # f32 reconstruct
    day_th = day[:mt]                                                    # (Mt, H)
    day_tp = day[mt:]                                                    # (Mt, H)

    # ---- weekday gathers (cols 1 and 3): V=8 -> VPU select/sum, exact f32 ----
    wk = week_ref[...]                                                   # (8, H) f32
    ids_wh = idx[:, 1:2]
    ids_wp = idx[:, 3:4]
    wk_th = jnp.zeros((mt, h), jnp.float32)
    wk_tp = jnp.zeros((mt, h), jnp.float32)
    for v in range(vw):                                                  # static unroll
        row = wk[v:v + 1, :]                                             # (1, H), shared
        wk_th = wk_th + jnp.where(ids_wh == v, row, 0.0)
        wk_tp = wk_tp + jnp.where(ids_wp == v, row, 0.0)

    # ---- write directly into column slices of the lane-dense output slab ----
    out_ref[:, 0 * h:1 * h] = day_th
    out_ref[:, 1 * h:2 * h] = wk_th
    out_ref[:, 2 * h:3 * h] = day_tp
    out_ref[:, 3 * h:4 * h] = wk_tp


def patch_embedding_time(x, daytime_weight, weekday_weight, *,
                         patch_len, stride, his, block_rows=512):
    """Pallas equivalent of PatchEmbedding_time(...).forward(x).

    x               : (bs, ts, n_nodes, dim>=4) integer time features
    daytime_weight  : (1441, d_model//2) float32
    weekday_weight  : (8,    d_model//2) float32
    returns (x_th, x_tp), each (bs, num_patch, n_nodes, d_model) float32
    """
    bs, ts, n_nodes, dim = x.shape
    assert dim >= 4, "need at least 4 time-feature channels"
    h = daytime_weight.shape[1]
    assert weekday_weight.shape[1] == h
    d_model = 2 * h

    if his == ts:
        size, step = patch_len, stride
    else:
        gap = his // ts
        # TODO(synk): assumes patch_len % gap == 0 and stride % gap == 0 (as in the module)
        size, step = patch_len // gap, stride // gap
    num_patch = (ts - size) // step + 1

    # idx[b, p, n, d] = x[b, p*step, n, d]  (first element of every unfolded patch)
    idx = x[:, : (num_patch - 1) * step + 1 : step, :, :4]
    idx = idx.astype(jnp.int32).reshape(-1, 4)          # (M, 4), rows ordered (b, p, n)
    m_total = idx.shape[0]

    # Blocking: >= 2 grid steps when there is enough work (v7x megacore sharding),
    # block chosen so padding never nearly doubles the padded row count.
    n_blocks = max(pl.cdiv(m_total, block_rows), 2 if m_total >= 16 else 1)
    mt = _round_up(pl.cdiv(m_total, n_blocks), 8)
    m_pad = mt * n_blocks
    if m_pad != m_total:
        idx = jnp.pad(idx, ((0, m_pad - m_total), (0, 0)))   # index 0 is a valid pad

    day_tab = _bf16_split3_cols(daytime_weight)          # (1441, 3H) bf16
    week_tab = weekday_weight.astype(jnp.float32)        # (8, H) f32

    out = pl.pallas_call(
        _embed_kernel,
        out_shape=jax.ShapeDtypeStruct((m_pad, 2 * d_model), jnp.float32),
        grid=(m_pad // mt,),
        in_specs=[
            pl.BlockSpec((mt, 4), lambda i: (i, 0)),
            pl.BlockSpec(day_tab.shape, lambda i: (0, 0)),    # VMEM-resident table
            pl.BlockSpec(week_tab.shape, lambda i: (0, 0)),   # VMEM-resident table
        ],
        out_specs=pl.BlockSpec((mt, 2 * d_model), lambda i: (i, 0)),
        compiler_params=pltpu.CompilerParams(
            dimension_semantics=("parallel",),
            vmem_limit_bytes=32 * 1024 * 1024),
    )(idx, day_tab, week_tab)

    x_th = out[:m_total, :d_model].reshape(bs, num_patch, n_nodes, d_model)
    x_tp = out[:m_total, d_model:].reshape(bs, num_patch, n_nodes, d_model)
    return x_th, x_tp


def _reference(xn, dayn, weekn, patch_len, stride, his):
    """Numpy re-implementation of the PyTorch forward."""
    bs, ts, n_nodes, _ = xn.shape
    gap = 1 if his == ts else his // ts
    step = stride // gap
    size = patch_len // gap
    num_patch = (ts - size) // step + 1
    sel = xn[:, : (num_patch - 1) * step + 1 : step, :, :]              # (bs, P, nn, 4)
    ref_th = np.concatenate([dayn[sel[..., 0]], weekn[sel[..., 1]]], axis=-1)
    ref_tp = np.concatenate([dayn[sel[..., 2]], weekn[sel[..., 3]]], axis=-1)
    return ref_th, ref_tp, num_patch


if __name__ == "__main__":
    key = jax.random.PRNGKey(0)
    k_day, k_week, k_td, k_dw = jax.random.split(key, 4)

    # Small shapes consistent with the module.
    bs, ts, n_nodes, dim = 2, 16, 8, 4
    d_model, patch_len, stride = 64, 4, 4
    minute_size, weekday_size = 1440 + 1, 7 + 1

    daytime_w = jax.random.normal(k_day, (minute_size, d_model // 2), dtype=jnp.float32)
    weekday_w = jax.random.normal(k_week, (weekday_size, d_model // 2), dtype=jnp.float32)

    td = jax.random.randint(k_td, (bs, ts, n_nodes, 2), 0, minute_size, dtype=jnp.int32)
    dw = jax.random.randint(k_dw, (bs, ts, n_nodes, 2), 0, weekday_size, dtype=jnp.int32)
    # Channel layout expected by the module: [daytime_h, weekday_h, daytime_p, weekday_p]
    x = jnp.stack([td[..., 0], dw[..., 0], td[..., 1], dw[..., 1]], axis=-1)

    xn = np.asarray(x)
    dayn = np.asarray(daytime_w)
    weekn = np.asarray(weekday_w)

    # ---- branch 1: his == ts ----
    his = ts
    x_th, x_tp = patch_embedding_time(
        x, daytime_w, weekday_w, patch_len=patch_len, stride=stride, his=his)
    x_th, x_tp = jax.block_until_ready((x_th, x_tp))
    ref_th, ref_tp, num_patch = _reference(xn, dayn, weekn, patch_len, stride, his)
    assert x_th.shape == (bs, num_patch, n_nodes, d_model) and x_th.dtype == jnp.float32
    assert x_tp.shape == (bs, num_patch, n_nodes, d_model) and x_tp.dtype == jnp.float32
    np.testing.assert_allclose(np.asarray(x_th), ref_th, rtol=1e-5, atol=1e-5)
    np.testing.assert_allclose(np.asarray(x_tp), ref_tp, rtol=1e-5, atol=1e-5)

    # ---- branch 2: his != ts (gap = 2) ----
    his2 = 2 * ts
    x_th2, x_tp2 = patch_embedding_time(
        x, daytime_w, weekday_w, patch_len=patch_len, stride=stride, his=his2)
    x_th2, x_tp2 = jax.block_until_ready((x_th2, x_tp2))
    ref_th2, ref_tp2, num_patch2 = _reference(xn, dayn, weekn, patch_len, stride, his2)
    assert x_th2.shape == (bs, num_patch2, n_nodes, d_model)
    np.testing.assert_allclose(np.asarray(x_th2), ref_th2, rtol=1e-5, atol=1e-5)
    np.testing.assert_allclose(np.asarray(x_tp2), ref_tp2, rtol=1e-5, atol=1e-5)

    print("KERNEL_OK")
</pallas_src>

<mosaic_0001>
module attributes {stable_mosaic.version = 11 : i64} {
  func.func @_embed_kernel(%arg0: i32, %arg1: memref<32x4xi32, #tpu.memory_space<vmem>>, %arg2: memref<1441x96xbf16, #tpu.memory_space<vmem>>, %arg3: memref<8x32xf32, #tpu.memory_space<vmem>>, %arg4: memref<32x128xf32, #tpu.memory_space<vmem>>) attributes {dimension_semantics = [#tpu.dimension_semantics<parallel>], iteration_bounds = array<i64: 2>, scalar_prefetch = 0 : i64, scratch_operands = 0 : i64, tpu.core_type = #tpu.core_type<tc>, window_params = [{transform_indices = @transform_0, window_bounds = array<i64: 32, 4>}, {pipeline_mode = #tpu.pipeline_mode<synchronous>, transform_indices = @transform_1, window_bounds = array<i64: 1441, 96>}, {pipeline_mode = #tpu.pipeline_mode<synchronous>, transform_indices = @transform_2, window_bounds = array<i64: 8, 32>}, {transform_indices = @transform_3, window_bounds = array<i64: 32, 128>}]} {
    %c0 = arith.constant 0 : index
    %c0_0 = arith.constant 0 : index
    %0 = vector.load %arg1[%c0, %c0_0] : memref<32x4xi32, #tpu.memory_space<vmem>>, vector<32x4xi32>
    %1 = vector.extract_strided_slice %0 {offsets = [0, 0], sizes = [32, 1], strides = [1, 1]} : vector<32x4xi32> to vector<32x1xi32>
    %2 = vector.extract_strided_slice %0 {offsets = [0, 2], sizes = [32, 1], strides = [1, 1]} : vector<32x4xi32> to vector<32x1xi32>
    %3 = tpu.concatenate %1, %2 in 0 : vector<32x1xi32>, vector<32x1xi32> -> vector<64x1xi32>
    %4 = tpu.iota {dimensions = array<i32: 1>} : vector<64x1441xi32>
    %5 = vector.broadcast %3 : vector<64x1xi32> to vector<64x1441xi32>
    %6 = arith.cmpi eq, %5, %4 : vector<64x1441xi32>
    %7 = arith.extui %6 : vector<64x1441xi1> to vector<64x1441xi32>
    %8 = arith.sitofp %7 : vector<64x1441xi32> to vector<64x1441xf32>
    %9 = arith.truncf %8 : vector<64x1441xf32> to vector<64x1441xbf16>
    %c0_1 = arith.constant 0 : index
    %c0_2 = arith.constant 0 : index
    %10 = vector.load %arg2[%c0_1, %c0_2] : memref<1441x96xbf16, #tpu.memory_space<vmem>>, vector<1441x96xbf16>
    %cst = arith.constant dense<0.000000e+00> : vector<64x96xf32>
    %11 = tpu.matmul %9, %10, %cst {dimension_numbers = #tpu.dot_dimension_numbers<[1], [0], [0], [1], [0, 0, 1, 1], [], []>} : vector<64x1441xbf16>, vector<1441x96xbf16>, vector<64x96xf32> -> vector<64x96xf32>
    %12 = vector.extract_strided_slice %11 {offsets = [0, 0], sizes = [64, 32], strides = [1, 1]} : vector<64x96xf32> to vector<64x32xf32>
    %13 = vector.extract_strided_slice %11 {offsets = [0, 32], sizes = [64, 32], strides = [1, 1]} : vector<64x96xf32> to vector<64x32xf32>
    %14 = arith.addf %12, %13 : vector<64x32xf32>
    %15 = vector.extract_strided_slice %11 {offsets = [0, 64], sizes = [64, 32], strides = [1, 1]} : vector<64x96xf32> to vector<64x32xf32>
    %16 = arith.addf %14, %15 : vector<64x32xf32>
    %17 = vector.extract_strided_slice %16 {offsets = [0, 0], sizes = [32, 32], strides = [1, 1]} : vector<64x32xf32> to vector<32x32xf32>
    %18 = vector.extract_strided_slice %16 {offsets = [32, 0], sizes = [32, 32], strides = [1, 1]} : vector<64x32xf32> to vector<32x32xf32>
    %c0_3 = arith.constant 0 : index
    %c0_4 = arith.constant 0 : index
    %19 = vector.load %arg3[%c0_3, %c0_4] : memref<8x32xf32, #tpu.memory_space<vmem>>, vector<8x32xf32>
    %20 = vector.extract_strided_slice %0 {offsets = [0, 1], sizes = [32, 1], strides = [1, 1]} : vector<32x4xi32> to vector<32x1xi32>
    %21 = vector.extract_strided_slice %0 {offsets = [0, 3], sizes = [32, 1], strides = [1, 1]} : vector<32x4xi32> to vector<32x1xi32>
    %cst_5 = arith.constant 0.000000e+00 : f32
    %22 = vector.broadcast %cst_5 : f32 to vector<32x32xf32>
    %cst_6 = arith.constant 0.000000e+00 : f32
    %23 = vector.broadcast %cst_6 : f32 to vector<32x32xf32>
    %24 = vector.extract_strided_slice %19 {offsets = [0, 0], sizes = [1, 32], strides = [1, 1]} : vector<8x32xf32> to vector<1x32xf32>
    %c0_i32 = arith.constant 0 : i32
    %25 = vector.broadcast %c0_i32 : i32 to vector<32x1xi32>
    %26 = arith.cmpi eq, %20, %25 : vector<32x1xi32>
    %cst_7 = arith.constant 0.000000e+00 : f32
    %27 = vector.shape_cast %26 : vector<32x1xi1> to vector<32x1xi1>
    %28 = vector.broadcast %27 : vector<32x1xi1> to vector<32x32xi1>
    %29 = vector.shape_cast %24 : vector<1x32xf32> to vector<1x32xf32>
    %30 = vector.broadcast %29 : vector<1x32xf32> to vector<32x32xf32>
    %31 = vector.broadcast %cst_7 : f32 to vector<32x32xf32>
    %32 = arith.select %28, %30, %31 : vector<32x32xi1>, vector<32x32xf32>
    %33 = arith.addf %22, %32 : vector<32x32xf32>
    %c0_i32_8 = arith.constant 0 : i32
    %34 = vector.broadcast %c0_i32_8 : i32 to vector<32x1xi32>
    %35 = arith.cmpi eq, %21, %34 : vector<32x1xi32>
    %cst_9 = arith.constant 0.000000e+00 : f32
    %36 = vector.shape_cast %35 : vector<32x1xi1> to vector<32x1xi1>
    %37 = vector.broadcast %36 : vector<32x1xi1> to vector<32x32xi1>
    %38 = vector.shape_cast %24 : vector<1x32xf32> to vector<1x32xf32>
    %39 = vector.broadcast %38 : vector<1x32xf32> to vector<32x32xf32>
    %40 = vector.broadcast %cst_9 : f32 to vector<32x32xf32>
    %41 = arith.select %37, %39, %40 : vector<32x32xi1>, vector<32x32xf32>
    %42 = arith.addf %23, %41 : vector<32x32xf32>
    %43 = vector.extract_strided_slice %19 {offsets = [1, 0], sizes = [1, 32], strides = [1, 1]} : vector<8x32xf32> to vector<1x32xf32>
    %c1_i32 = arith.constant 1 : i32
    %44 = vector.broadcast %c1_i32 : i32 to vector<32x1xi32>
    %45 = arith.cmpi eq, %20, %44 : vector<32x1xi32>
    %cst_10 = arith.constant 0.000000e+00 : f32
    %46 = vector.shape_cast %45 : vector<32x1xi1> to vector<32x1xi1>
    %47 = vector.broadcast %46 : vector<32x1xi1> to vector<32x32xi1>
    %48 = vector.shape_cast %43 : vector<1x32xf32> to vector<1x32xf32>
    %49 = vector.broadcast %48 : vector<1x32xf32> to vector<32x32xf32>
    %50 = vector.broadcast %cst_10 : f32 to vector<32x32xf32>
    %51 = arith.select %47, %49, %50 : vector<32x32xi1>, vector<32x32xf32>
    %52 = arith.addf %33, %51 : vector<32x32xf32>
    %c1_i32_11 = arith.constant 1 : i32
    %53 = vector.broadcast %c1_i32_11 : i32 to vector<32x1xi32>
    %54 = arith.cmpi eq, %21, %53 : vector<32x1xi32>
    %cst_12 = arith.constant 0.000000e+00 : f32
    %55 = vector.shape_cast %54 : vector<32x1xi1> to vector<32x1xi1>
    %56 = vector.broadcast %55 : vector<32x1xi1> to vector<32x32xi1>
    %57 = vector.shape_cast %43 : vector<1x32xf32> to vector<1x32xf32>
    %58 = vector.broadcast %57 : vector<1x32xf32> to vector<32x32xf32>
    %59 = vector.broadcast %cst_12 : f32 to vector<32x32xf32>
    %60 = arith.select %56, %58, %59 : vector<32x32xi1>, vector<32x32xf32>
    %61 = arith.addf %42, %60 : vector<32x32xf32>
    %62 = vector.extract_strided_slice %19 {offsets = [2, 0], sizes = [1, 32], strides = [1, 1]} : vector<8x32xf32> to vector<1x32xf32>
    %c2_i32 = arith.constant 2 : i32
    %63 = vector.broadcast %c2_i32 : i32 to vector<32x1xi32>
    %64 = arith.cmpi eq, %20, %63 : vector<32x1xi32>
    %cst_13 = arith.constant 0.000000e+00 : f32
    %65 = vector.shape_cast %64 : vector<32x1xi1> to vector<32x1xi1>
    %66 = vector.broadcast %65 : vector<32x1xi1> to vector<32x32xi1>
    %67 = vector.shape_cast %62 : vector<1x32xf32> to vector<1x32xf32>
    %68 = vector.broadcast %67 : vector<1x32xf32> to vector<32x32xf32>
    %69 = vector.broadcast %cst_13 : f32 to vector<32x32xf32>
    %70 = arith.select %66, %68, %69 : vector<32x32xi1>, vector<32x32xf32>
    %71 = arith.addf %52, %70 : vector<32x32xf32>
    %c2_i32_14 = arith.constant 2 : i32
    %72 = vector.broadcast %c2_i32_14 : i32 to vector<32x1xi32>
    %73 = arith.cmpi eq, %21, %72 : vector<32x1xi32>
    %cst_15 = arith.constant 0.000000e+00 : f32
    %74 = vector.shape_cast %73 : vector<32x1xi1> to vector<32x1xi1>
    %75 = vector.broadcast %74 : vector<32x1xi1> to vector<32x32xi1>
    %76 = vector.shape_cast %62 : vector<1x32xf32> to vector<1x32xf32>
    %77 = vector.broadcast %76 : vector<1x32xf32> to vector<32x32xf32>
    %78 = vector.broadcast %cst_15 : f32 to vector<32x32xf32>
    %79 = arith.select %75, %77, %78 : vector<32x32xi1>, vector<32x32xf32>
    %80 = arith.addf %61, %79 : vector<32x32xf32>
    %81 = vector.extract_strided_slice %19 {offsets = [3, 0], sizes = [1, 32], strides = [1, 1]} : vector<8x32xf32> to vector<1x32xf32>
    %c3_i32 = arith.constant 3 : i32
    %82 = vector.broadcast %c3_i32 : i32 to vector<32x1xi32>
    %83 = arith.cmpi eq, %20, %82 : vector<32x1xi32>
    %cst_16 = arith.constant 0.000000e+00 : f32
    %84 = vector.shape_cast %83 : vector<32x1xi1> to vector<32x1xi1>
    %85 = vector.broadcast %84 : vector<32x1xi1> to vector<32x32xi1>
    %86 = vector.shape_cast %81 : vector<1x32xf32> to vector<1x32xf32>
    %87 = vector.broadcast %86 : vector<1x32xf32> to vector<32x32xf32>
    %88 = vector.broadcast %cst_16 : f32 to vector<32x32xf32>
    %89 = arith.select %85, %87, %88 : vector<32x32xi1>, vector<32x32xf32>
    %90 = arith.addf %71, %89 : vector<32x32xf32>
    %c3_i32_17 = arith.constant 3 : i32
    %91 = vector.broadcast %c3_i32_17 : i32 to vector<32x1xi32>
    %92 = arith.cmpi eq, %21, %91 : vector<32x1xi32>
    %cst_18 = arith.constant 0.000000e+00 : f32
    %93 = vector.shape_cast %92 : vector<32x1xi1> to vector<32x1xi1>
    %94 = vector.broadcast %93 : vector<32x1xi1> to vector<32x32xi1>
    %95 = vector.shape_cast %81 : vector<1x32xf32> to vector<1x32xf32>
    %96 = vector.broadcast %95 : vector<1x32xf32> to vector<32x32xf32>
    %97 = vector.broadcast %cst_18 : f32 to vector<32x32xf32>
    %98 = arith.select %94, %96, %97 : vector<32x32xi1>, vector<32x32xf32>
    %99 = arith.addf %80, %98 : vector<32x32xf32>
    %100 = vector.extract_strided_slice %19 {offsets = [4, 0], sizes = [1, 32], strides = [1, 1]} : vector<8x32xf32> to vector<1x32xf32>
    %c4_i32 = arith.constant 4 : i32
    %101 = vector.broadcast %c4_i32 : i32 to vector<32x1xi32>
    %102 = arith.cmpi eq, %20, %101 : vector<32x1xi32>
    %cst_19 = arith.constant 0.000000e+00 : f32
    %103 = vector.shape_cast %102 : vector<32x1xi1> to vector<32x1xi1>
    %104 = vector.broadcast %103 : vector<32x1xi1> to vector<32x32xi1>
    %105 = vector.shape_cast %100 : vector<1x32xf32> to vector<1x32xf32>
    %106 = vector.broadcast %105 : vector<1x32xf32> to vector<32x32xf32>
    %107 = vector.broadcast %cst_19 : f32 to vector<32x32xf32>
    %108 = arith.select %104, %106, %107 : vector<32x32xi1>, vector<32x32xf32>
    %109 = arith.addf %90, %108 : vector<32x32xf32>
    %c4_i32_20 = arith.constant 4 : i32
    %110 = vector.broadcast %c4_i32_20 : i32 to vector<32x1xi32>
    %111 = arith.cmpi eq, %21, %110 : vector<32x1xi32>
    %cst_21 = arith.constant 0.000000e+00 : f32
    %112 = vector.shape_cast %111 : vector<32x1xi1> to vector<32x1xi1>
    %113 = vector.broadcast %112 : vector<32x1xi1> to vector<32x32xi1>
    %114 = vector.shape_cast %100 : vector<1x32xf32> to vector<1x32xf32>
    %115 = vector.broadcast %114 : vector<1x32xf32> to vector<32x32xf32>
    %116 = vector.broadcast %cst_21 : f32 to vector<32x32xf32>
    %117 = arith.select %113, %115, %116 : vector<32x32xi1>, vector<32x32xf32>
    %118 = arith.addf %99, %117 : vector<32x32xf32>
    %119 = vector.extract_strided_slice %19 {offsets = [5, 0], sizes = [1, 32], strides = [1, 1]} : vector<8x32xf32> to vector<1x32xf32>
    %c5_i32 = arith.constant 5 : i32
    %120 = vector.broadcast %c5_i32 : i32 to vector<32x1xi32>
    %121 = arith.cmpi eq, %20, %120 : vector<32x1xi32>
    %cst_22 = arith.constant 0.000000e+00 : f32
    %122 = vector.shape_cast %121 : vector<32x1xi1> to vector<32x1xi1>
    %123 = vector.broadcast %122 : vector<32x1xi1> to vector<32x32xi1>
    %124 = vector.shape_cast %119 : vector<1x32xf32> to vector<1x32xf32>
    %125 = vector.broadcast %124 : vector<1x32xf32> to vector<32x32xf32>
    %126 = vector.broadcast %cst_22 : f32 to vector<32x32xf32>
    %127 = arith.select %123, %125, %126 : vector<32x32xi1>, vector<32x32xf32>
    %128 = arith.addf %109, %127 : vector<32x32xf32>
    %c5_i32_23 = arith.constant 5 : i32
    %129 = vector.broadcast %c5_i32_23 : i32 to vector<32x1xi32>
    %130 = arith.cmpi eq, %21, %129 : vector<32x1xi32>
    %cst_24 = arith.constant 0.000000e+00 : f32
    %131 = vector.shape_cast %130 : vector<32x1xi1> to vector<32x1xi1>
    %132 = vector.broadcast %131 : vector<32x1xi1> to vector<32x32xi1>
    %133 = vector.shape_cast %119 : vector<1x32xf32> to vector<1x32xf32>
    %134 = vector.broadcast %133 : vector<1x32xf32> to vector<32x32xf32>
    %135 = vector.broadcast %cst_24 : f32 to vector<32x32xf32>
    %136 = arith.select %132, %134, %135 : vector<32x32xi1>, vector<32x32xf32>
    %137 = arith.addf %118, %136 : vector<32x32xf32>
    %138 = vector.extract_strided_slice %19 {offsets = [6, 0], sizes = [1, 32], strides = [1, 1]} : vector<8x32xf32> to vector<1x32xf32>
    %c6_i32 = arith.constant 6 : i32
    %139 = vector.broadcast %c6_i32 : i32 to vector<32x1xi32>
    %140 = arith.cmpi eq, %20, %139 : vector<32x1xi32>
    %cst_25 = arith.constant 0.000000e+00 : f32
    %141 = vector.shape_cast %140 : vector<32x1xi1> to vector<32x1xi1>
    %142 = vector.broadcast %141 : vector<32x1xi1> to vector<32x32xi1>
    %143 = vector.shape_cast %138 : vector<1x32xf32> to vector<1x32xf32>
    %144 = vector.broadcast %143 : vector<1x32xf32> to vector<32x32xf32>
    %145 = vector.broadcast %cst_25 : f32 to vector<32x32xf32>
    %146 = arith.select %142, %144, %145 : vector<32x32xi1>, vector<32x32xf32>
    %147 = arith.addf %128, %146 : vector<32x32xf32>
    %c6_i32_26 = arith.constant 6 : i32
    %148 = vector.broadcast %c6_i32_26 : i32 to vector<32x1xi32>
    %149 = arith.cmpi eq, %21, %148 : vector<32x1xi32>
    %cst_27 = arith.constant 0.000000e+00 : f32
    %150 = vector.shape_cast %149 : vector<32x1xi1> to vector<32x1xi1>
    %151 = vector.broadcast %150 : vector<32x1xi1> to vector<32x32xi1>
    %152 = vector.shape_cast %138 : vector<1x32xf32> to vector<1x32xf32>
    %153 = vector.broadcast %152 : vector<1x32xf32> to vector<32x32xf32>
    %154 = vector.broadcast %cst_27 : f32 to vector<32x32xf32>
    %155 = arith.select %151, %153, %154 : vector<32x32xi1>, vector<32x32xf32>
    %156 = arith.addf %137, %155 : vector<32x32xf32>
    %157 = vector.extract_strided_slice %19 {offsets = [7, 0], sizes = [1, 32], strides = [1, 1]} : vector<8x32xf32> to vector<1x32xf32>
    %c7_i32 = arith.constant 7 : i32
    %158 = vector.broadcast %c7_i32 : i32 to vector<32x1xi32>
    %159 = arith.cmpi eq, %20, %158 : vector<32x1xi32>
    %cst_28 = arith.constant 0.000000e+00 : f32
    %160 = vector.shape_cast %159 : vector<32x1xi1> to vector<32x1xi1>
    %161 = vector.broadcast %160 : vector<32x1xi1> to vector<32x32xi1>
    %162 = vector.shape_cast %157 : vector<1x32xf32> to vector<1x32xf32>
    %163 = vector.broadcast %162 : vector<1x32xf32> to vector<32x32xf32>
    %164 = vector.broadcast %cst_28 : f32 to vector<32x32xf32>
    %165 = arith.select %161, %163, %164 : vector<32x32xi1>, vector<32x32xf32>
    %166 = arith.addf %147, %165 : vector<32x32xf32>
    %c7_i32_29 = arith.constant 7 : i32
    %167 = vector.broadcast %c7_i32_29 : i32 to vector<32x1xi32>
    %168 = arith.cmpi eq, %21, %167 : vector<32x1xi32>
    %cst_30 = arith.constant 0.000000e+00 : f32
    %169 = vector.shape_cast %168 : vector<32x1xi1> to vector<32x1xi1>
    %170 = vector.broadcast %169 : vector<32x1xi1> to vector<32x32xi1>
    %171 = vector.shape_cast %157 : vector<1x32xf32> to vector<1x32xf32>
    %172 = vector.broadcast %171 : vector<1x32xf32> to vector<32x32xf32>
    %173 = vector.broadcast %cst_30 : f32 to vector<32x32xf32>
    %174 = arith.select %170, %172, %173 : vector<32x32xi1>, vector<32x32xf32>
    %175 = arith.addf %156, %174 : vector<32x32xf32>
    %c0_31 = arith.constant 0 : index
    %c0_32 = arith.constant 0 : index
    %176 = vector.load %arg4[%c0_31, %c0_32] : memref<32x128xf32, #tpu.memory_space<vmem>>, vector<32x32xf32>
    tpu.vector_store %arg4[%c0_31, %c0_32], %17 {strides = array<i32>} : memref<32x128xf32, #tpu.memory_space<vmem>>, vector<32x32xf32>,
    %c0_33 = arith.constant 0 : index
    %c32 = arith.constant 32 : index
    %177 = vector.load %arg4[%c0_33, %c32] : memref<32x128xf32, #tpu.memory_space<vmem>>, vector<32x32xf32>
    tpu.vector_store %arg4[%c0_33, %c32], %166 {strides = array<i32>} : memref<32x128xf32, #tpu.memory_space<vmem>>, vector<32x32xf32>,
    %c0_34 = arith.constant 0 : index
    %c64 = arith.constant 64 : index
    %178 = vector.load %arg4[%c0_34, %c64] : memref<32x128xf32, #tpu.memory_space<vmem>>, vector<32x32xf32>
    tpu.vector_store %arg4[%c0_34, %c64], %18 {strides = array<i32>} : memref<32x128xf32, #tpu.memory_space<vmem>>, vector<32x32xf32>,
    %c0_35 = arith.constant 0 : index
    %c96 = arith.constant 96 : index
    %179 = vector.load %arg4[%c0_35, %c96] : memref<32x128xf32, #tpu.memory_space<vmem>>, vector<32x32xf32>
    tpu.vector_store %arg4[%c0_35, %c96], %175 {strides = array<i32>} : memref<32x128xf32, #tpu.memory_space<vmem>>, vector<32x32xf32>,
    return
  }
  func.func @transform_0(%arg0: i32) -> (i32, i32) {
    %c0_i32 = arith.constant 0 : i32
    %c0_i32_0 = arith.constant 0 : i32
    return %arg0, %c0_i32 : i32, i32
  }
  func.func @transform_1(%arg0: i32) -> (i32, i32) {
    %c0_i32 = arith.constant 0 : i32
    %c0_i32_0 = arith.constant 0 : i32
    %c0_i32_1 = arith.constant 0 : i32
    return %c0_i32, %c0_i32_0 : i32, i32
  }
  func.func @transform_2(%arg0: i32) -> (i32, i32) {
    %c0_i32 = arith.constant 0 : i32
    %c0_i32_0 = arith.constant 0 : i32
    %c0_i32_1 = arith.constant 0 : i32
    return %c0_i32, %c0_i32_0 : i32, i32
  }
  func.func @transform_3(%arg0: i32) -> (i32, i32) {
    %c0_i32 = arith.constant 0 : i32
    %c0_i32_0 = arith.constant 0 : i32
    return %arg0, %c0_i32 : i32, i32
  }
}

</mosaic_0001>

<bundles_post_ra>
// kernel: tpu_custom_call.1
= control target key start
LH: loop header
LB: loop body
LE: loop exit
PB: predicated region body
PF: predicated region fallthrough
CT: control target
= control target key end

     0   :  { %8 = vsyncpa [#allocation3], 0  ;;  %s4713_s0 = inlined_call_operand.vmem [shape: s32[64,4], index: 0, kind: input, shape index: {}]   ;;  %s4714_s1 = inlined_call_operand.vmem [shape: bf16[1441,96], index: 1, kind: input, shape index: {}]   ;;  %s4715_s2 = inlined_call_operand.vmem [shape: f32[8,32], index: 2, kind: input, shape index: {}]   ;;  %s4716_s3 = inlined_call_operand.hbm [shape: f32[64,128], index: 3, kind: output, shape index: {}]  }
   0x1   :  { %10 = vsyncpa [#allocation3 + $0x1], 0  ;;  %s3163_s12 = smov 0   ;;  %s3165_s13 = smov 0  }
   0x2   :  { %s3167_s14 = smov 0   ;;  %s3169_s15 = smov 0  }
   0x3 LB: > { %s3184_s16 = sadd.s32 4294967295, %s3130_s15   ;;  %s2324_s17 = sadd.s32 4294967294, %s3130_s15   ;;  %s3130_s15 = sphi %s3169_s15, %s4876_s15   ;;  %s3126_s14 = sphi %s3167_s14, %s4875_s14   ;;  %s3122_s13 = sphi %s3165_s13, %s4874_s13   ;;  %s3118_s12 = sphi %s3163_s12, %s4873_s12  }
   0x4   : > { %s3188_s18 = sadd.s32 1, %s3130_s15   ;;  %s91_s19 = sadd.s32 1, %s3126_s14 }
   0x5   : > { %s88_s20 = ssub.s32 %s3130_s15, %s3188_s18  ;;  %p101_p0 = scmp.ne.s32.totalorder %s3126_s14, %s3122_s13 }
   0x6   : > { %p89_p1 = scmp.eq.s32.totalorder %s88_s20, 0  ;;  %p102_p2 = scmp.eq.s32.totalorder %s3184_s16, 1 }
   0x7   : > { %p107_p3 = scmp.ne.s32.totalorder %s3122_s13, %s3118_s12  ;;  %p108_p4 = scmp.eq.s32.totalorder %s2324_s17, 1 }
   0x8   : > { %s3199_s21 = scalar_select %p89_p1, %s3126_s14, %s91_s19  }
   0x9   : > { %p3201_p5 = por %p102_p2, %p101_p0  ;;  %p3205_p6 = por %p108_p4, %p107_p3 }
   0xa   : > { %p2327_p7 = scmp.ge.s32.totalorder %s3130_s15, 1  ;;  %p141_p8 = scmp.lt.s32.totalorder %s3130_s15, 3 }
   0xc   : > { %p142_p9 = pnand %p2327_p7, %p141_p8 }
   0xe   : > { %145 = sbr.rel (%p142_p9) target bundleno = 812 (0x32c), region = 32 }
  0x13   : > { %s2329_s24 = sshll.u32 %s3184_s16, 2  ;;  %v4723_v0 = vmov 0   ;;  %s3133_s29 = smov 126   ;;  %v2907_v5 = vld [vmem:[%s4714_s1 + $0xb8] sm:$0xff]  ;;  %v2906_v11 = vld [vmem:[%s4714_s1 + $0xb0] sm:$0xff]  ;;  %v2905_v15 = vld [vmem:[%s4714_s1 + $0xa8] sm:$0xff]  ;;  %v185_v45 = vlaneseq }
  0x14   : > { %p166_p10 = scmp.lt.s32.totalorder %s2329_s24, 7  ;;  %3025 = vset.pattern.permute.xlu2 %v4723_v0  ;;  %3027 = vset.pattern.permute.xlu1 %v4723_v0  ;;  %v2915_v6 = vld [vmem:[%s4714_s1 + $0xf8] sm:$0xff]  ;;  %v2914_v12 = vld [vmem:[%s4714_s1 + $0xf0] sm:$0xff]  ;;  %v2913_v16 = vld [vmem:[%s4714_s1 + $0xe8] sm:$0xff]  ;;  %v4717_v30 = vmov 1   ;;  %v4721_v32 = vmov 3  }
  0x15   : > { %3026 = vset.pattern.permute.xlu0 %v4723_v0  ;;  %1359 = vmatpush.bf16.msra.mxu2 %v2907_v5  ;;  %v2891_v9 = vld [vmem:[%s4714_s1 + $0x38] sm:$0xff]  ;;  %v2890_v13 = vld [vmem:[%s4714_s1 + $0x30] sm:$0xff]  ;;  %v2889_v19 = vld [vmem:[%s4714_s1 + $0x28] sm:$0xff]  ;;  %v3352_v49 = vand.u32 127, %v185_v45  ;;  %v4719_v54 = vmov 1.0|1.0  }
  0x16   : > { %s4878_s24 = smov (!%p166_p10, %s2329_s24), 7  ;;  %1388 = vmatpush.bf16.msra.mxu3 %v2915_v6  ;;  %v2899_v10 = vld [vmem:[%s4714_s1 + $0x78] sm:$0xff]  ;;  %1301 = vmatpush.bf16.msra.mxu0 %v2891_v9  ;;  %v2898_v14 = vld [vmem:[%s4714_s1 + $0x70] sm:$0xff]  ;;  %v2897_v20 = vld [vmem:[%s4714_s1 + $0x68] sm:$0xff]  ;;  %s3139_s26 = smov 96  }
  0x17   : > { %s2330_s25 = sshll.u32 %s4878_s24, 3  ;;  %1330 = vmatpush.bf16.msra.mxu1 %v2899_v10  ;;  %v2904_v21 = vld [vmem:[%s4714_s1 + $0xa0] sm:$0xff]  ;;  %v2903_v26 = vld [vmem:[%s4714_s1 + $0x98] sm:$0xff]  ;;  %v2902_v33 = vld [vmem:[%s4714_s1 + $0x90] sm:$0xff]  ;;  %v3358_v51 = vadd.s32 256, %v3352_v49  ;;  %v3361_v52 = vadd.s32 384, %v3352_v49 }
  0x18   : > { %s3218_s28 = scalar_lea.vmem %s4713_s0, %s2330_s25  ;;  %v2912_v22 = vld [vmem:[%s4714_s1 + $0xe0] sm:$0xff]  ;;  %v2911_v28 = vld [vmem:[%s4714_s1 + $0xd8] sm:$0xff]  ;;  %v2910_v34 = vld [vmem:[%s4714_s1 + $0xd0] sm:$0xff]  ;;  %v3369_v53 = vadd.s32 128, %v3352_v49  ;;  %v3402_v59 = vadd.s32 512, %v3352_v49  ;;  %v3405_v60 = vadd.s32 640, %v3352_v49 }
  0x19   : > { %v3221_v1 = vld [vmem:[%s3218_s28 + $0x10] sm:$0xff]  ;;  %v3224_v2 = vld [vmem:[%s3218_s28] sm:$0xff]  ;;  %v3230_v3 = vld [vmem:[%s3218_s28 + $0x18] sm:$0xff]  ;;  %1360 = vmatpush.bf16.msra.mxu2 %v2906_v11  ;;  %v3408_v61 = vadd.s32 768, %v3352_v49  ;;  %v3411_v62 = vadd.s32 896, %v3352_v49  ;;  %v4733_v11 = vmov 0 }
  0x1a   : > { %181 = vrot.lane.b32.xlu1 %v3221_v1, %s3133_s29  ;;  %177 = vrot.lane.b32.xlu0 %v3224_v2, %s3133_s29  ;;  %v3233_v4 = vld [vmem:[%s3218_s28 + $0x8] sm:$0xff]  ;;  %vm1722_vm0 = vcmp.eq.s32.totalorder %v3224_v2, 0  ;;  %vm1724_vm1 = vcmp.eq.s32.totalorder %v3221_v1, 0  ;;  %v2888_v23 = vld [vmem:[%s4714_s1 + $0x20] sm:$0xff]  ;;  %vm1725_vm2 = vcmp.eq.s32.totalorder %v3230_v3, 0  ;;  %vm1779_vm14 = vcmp.eq.s32.totalorder %v3224_v2, 1 }
  0x1b   : > { %199 = vperm.xlu2 %3025, %v3224_v2   ;;  %1389 = vmatpush.bf16.msra.mxu3 %v2914_v12  ;;  %v2896_v24 = vld [vmem:[%s4714_s1 + $0x60] sm:$0xff]  ;;  %v1726_v25 = vsel %vm1722_vm0, 1, %v4723_v0  ;;  %v1728_v27 = vsel %vm1724_vm1, 1, %v4723_v0  ;;  %v2887_v29 = vld [vmem:[%s4714_s1 + $0x18] sm:$0xff]  ;;  %v2886_v35 = vld [vmem:[%s4714_s1 + $0x10] sm:$0xff]  ;;  %v1729_v37 = vsel %vm1725_vm2, 1, %v4723_v0 }
  0x1c   : > { %1302 = vmatpush.bf16.msra.mxu0 %v2890_v13  ;;  %1331 = vmatpush.bf16.msra.mxu1 %v2898_v14  ;;  %v2895_v31 = vld [vmem:[%s4714_s1 + $0x58] sm:$0xff]  ;;  %v2894_v36 = vld [vmem:[%s4714_s1 + $0x50] sm:$0xff]  ;;  %v2901_v39 = vld [vmem:[%s4714_s1 + $0x88] sm:$0xff]  ;;  %vm1723_vm3 = vcmp.eq.s32.totalorder %v3233_v4, 0  ;;  %vm1780_vm0 = vcmp.eq.s32.totalorder %v3233_v4, 1  ;;  %v1783_v55 = vsel %vm1779_vm14, 1, %v4723_v0 }
  0x1d   : > { %1361 = vmatpush.bf16.msra.mxu2 %v2905_v15  ;;  %v2909_v40 = vld [vmem:[%s4714_s1 + $0xc8] sm:$0xff]  ;;  %v2900_v43 = vld [vmem:[%s4714_s1 + $0x80] sm:$0xff]  ;;  %v3350_v48 = vsel %vm1723_vm3, 1, %v4723_v0  ;;  %v1784_v56 = vsel %vm1780_vm0, 1, %v4723_v0  ;;  %vm1781_vm2 = vcmp.eq.s32.totalorder %v3221_v1, 1  ;;  %vm1838_vm3 = vcmp.eq.s32.totalorder %v3221_v1, 2 }
  0x1e   : > { %v2885_v41 = vld [vmem:[%s4714_s1 + $0x8] sm:$0xff]  ;;  %v2908_v44 = vld [vmem:[%s4714_s1 + $0xc0] sm:$0xff]  ;;  %v3396_v57 = vsel %vm1838_vm3, 1, %v4723_v0  ;;  %v1785_v58 = vsel %vm1781_vm2, 1, %v4723_v0  ;;  %v2939_v63 = vld [vmem:[%s4714_s1 + $0x1b8] sm:$0xff]  ;;  %vm1782_vm0 = vcmp.eq.s32.totalorder %v3230_v3, 1 }
  0x1f   : > { %1390 = vmatpush.bf16.msra.mxu3 %v2913_v16  ;;  %v2893_v42 = vld [vmem:[%s4714_s1 + $0x48] sm:$0xff]  ;;  %v2884_v46 = vld [vmem:[%s4714_s1] sm:$0xff]  ;;  %v2931_v9 = vld [vmem:[%s4714_s1 + $0x178] sm:$0xff]  ;;  %vm1837_vm2 = vcmp.eq.s32.totalorder %v3233_v4, 2  ;;  %v4735_v12 = vmov 0  ;;  %v4737_v13 = vmov 0 }
  0x20   : > { %1303 = vmatpush.bf16.msra.mxu0 %v2889_v19  ;;  %1332 = vmatpush.bf16.msra.mxu1 %v2897_v20  ;;  %v2892_v47 = vld [vmem:[%s4714_s1 + $0x40] sm:$0xff]  ;;  %v3473_v14 = vsel %vm1782_vm0, 1, %v4723_v0  ;;  %v3476_v15 = vsel %vm1837_vm2, 1, %v4723_v0  ;;  %v3479_v16 = vadd.s32 1024, %v3352_v49  ;;  %v3494_v19 = vadd.s32 1408, %v3352_v49  ;;  %v2938_v20 = vld [vmem:[%s4714_s1 + $0x1b0] sm:$0xff] }
  0x21   : > { %1362 = vmatpush.bf16.msra.mxu2 %v2904_v21  ;;  %v2922_v21 = vld [vmem:[%s4714_s1 + $0x130] sm:$0xff]  ;;  %s3140_s30 = smov 32   ;;  %s162_s4 = sand.u32 1, %s3122_s13  }
  0x22   : > { %183 = vrot.lane.b32.xlu1 %v3230_v3, %s3133_s29  ;;  %179 = vrot.lane.b32.xlu0 %v3233_v4, %s3133_s29  ;;  %s2328_s5 = sshll.u32 %s162_s4, 5  ;;  %s2974_s7 = sshll.u32 %s3184_s16, 5 }
  0x23   : > { %202 = vperm.xlu2 %3025, %v3233_v4   ;;  %1391 = vmatpush.bf16.msra.mxu3 %v2912_v22  ;;  %v2946_v22 = vld [vmem:[%s4714_s1 + $0x1f0] sm:$0xff]  ;;  %s4618_s6 = scalar_lea.vmem [#allocation2], %s2328_s5  ;;  %s2258_s10 = scalar_lea.hbm %s4716_s3, %s2974_s7 }
  0x24   : > { %1304 = vmatpush.bf16.msra.mxu0 %v2888_v23  ;;  %1333 = vmatpush.bf16.msra.mxu1 %v2896_v24  ;;  %v2930_v24 = vld [vmem:[%s4714_s1 + $0x170] sm:$0xff]  ;;  %s2259_s11 = sshll.u32 %s4618_s6, 4  ;;  %s2261_s17 = sshll.u32 %s2258_s10, 4  ;;  %s2260_s11 = int_to_ptr.vmem [resolvable:$true] %s2259_s11  ;;  %s2262_s17 = int_to_ptr.hbm [resolvable:$true] %s2261_s17 }
  0x25   : > { %1363 = vmatpush.bf16.msra.mxu2 %v2903_v26  ;;  %v2921_v26 = vld [vmem:[%s4714_s1 + $0x128] sm:$0xff]  ;;  %s2247_s16 = scalar_lea.sflag [#allocation3], %s162_s4  ;;  %s3082_s19 = sshra.s32 %s2262_s17, 4  ;;  %s3083_s19 = int_to_ptr.hbm [resolvable:$true] %s3082_s19 }
  0x26   : > { %s3084_s20 = scalar_lea.hbm %s3083_s19, 32  ;;  %p3089_p0 = scmp.lt.s32.totalorder %s3083_s19, %s4716_s3 }
  0x27   : > { %1392 = vmatpush.bf16.msra.mxu3 %v2911_v28  ;;  %v2945_v28 = vld [vmem:[%s4714_s1 + $0x1e8] sm:$0xff]  ;;  %p3085_p11 = scmp.ne.s32.totalorder %s3083_s19, %s3084_s20 }
  0x28   : > { %1305 = vmatpush.bf16.msra.mxu0 %v2887_v29  ;;  %1334 = vmatpush.bf16.msra.mxu1 %v2895_v31  ;;  %v4741_v29 = vmov 0  ;;  %v3137_v31 = vmov 0.0  }
  0x29   : > { %1364 = vmatpush.bf16.msra.mxu2 %v2902_v33  ;;  %p3086_p12 = pnand %p3085_p11, %p3201_p5 }
  0x2a   : > { %208 = vperm.xlu1 %3027, %v3230_v3   ;;  %205 = vperm.xlu0 %3026, %v3221_v1  }
  0x2b   : > { %1393 = vmatpush.bf16.msra.mxu3 %v2910_v34  ;;  %v2929_v34 = vld [vmem:[%s4714_s1 + $0x168] sm:$0xff]  ;;  %p3087_p13 = pneg %p3086_p12 }
  0x2c   : > { %1306 = vmatpush.bf16.msra.mxu0 %v2886_v35  ;;  %1335 = vmatpush.bf16.msra.mxu1 %v2894_v36  ;;  %v4743_v36 = vmov 0 }
  0x2d   : > { %1365 = vmatpush.bf16.msra.mxu2 %v2901_v39  ;;  %v2936_v39 = vld [vmem:[%s4714_s1 + $0x1a0] sm:$0xff] }
  0x2f   : > { %1394 = vmatpush.bf16.msra.mxu3 %v2909_v40 }
  0x30   : > { %1307 = vmatpush.bf16.msra.mxu0 %v2885_v41  ;;  %1336 = vmatpush.bf16.msra.mxu1 %v2893_v42  ;;  %v2944_v42 = vld [vmem:[%s4714_s1 + $0x1e0] sm:$0xff] }
  0x31   : > { %1366 = vmatpush.bf16.msra.mxu2 %v2900_v43  ;;  %v2928_v43 = vld [vmem:[%s4714_s1 + $0x160] sm:$0xff] }
  0x33   : > { %1395 = vmatpush.bf16.msra.mxu3 %v2908_v44  ;;  %v4745_v44 = vmov 0 }
  0x34   : > { %1308 = vmatpush.bf16.msra.mxu0 %v2884_v46  ;;  %1337 = vmatpush.bf16.msra.mxu1 %v2892_v47  ;;  %v4747_v46 = vmov 0  ;;  %v4749_v47 = vmov 0 }
  0x35   : > { %1475 = vmatpush.bf16.msrb.mxu2 %v2939_v63  ;;  %v4757_v63 = vmov 0 }
  0x38   : > { %1446 = vmatpush.bf16.msrb.mxu1 %v2931_v9  ;;  %v2919_v9 = vld [vmem:[%s4714_s1 + $0x118] sm:$0xff] }
  0x39   : > { %1476 = vmatpush.bf16.msrb.mxu2 %v2938_v20  ;;  %v2927_v20 = vld [vmem:[%s4714_s1 + $0x158] sm:$0xff] }
  0x3c   : > { %1447 = vmatpush.bf16.msrb.mxu1 %v2930_v24 }
  0x40   : > { %1448 = vmatpush.bf16.msrb.mxu1 %v2929_v34  ;;  %v2933_v34 = vld [vmem:[%s4714_s1 + $0x188] sm:$0xff] }
  0x44   : > { %1449 = vmatpush.bf16.msrb.mxu1 %v2928_v43  ;;  %v2932_v43 = vld [vmem:[%s4714_s1 + $0x180] sm:$0xff] }
  0x48   : > { %1450 = vmatpush.bf16.msrb.mxu1 %v2927_v20 }
  0x75   : > { %v3321_v38 = vpop.permute.xlu2 %199 }
  0x76   : > { %vm222_vm4 = vcmp.eq.s32.totalorder %v3321_v38, %v3352_v49  ;;  %vm224_vm7 = vcmp.eq.s32.totalorder %v3321_v38, %v3358_v51  ;;  %vm225_vm9 = vcmp.eq.s32.totalorder %v3321_v38, %v3361_v52  ;;  %vm223_vm12 = vcmp.eq.s32.totalorder %v3321_v38, %v3369_v53 }
  0x77   : > { %vm229_vm14 = vcmp.eq.s32.totalorder %v3321_v38, %v3411_v62  ;;  %vm230_vm0 = vcmp.eq.s32.totalorder %v3321_v38, %v3479_v16 }
  0x7d   : > { %v3354_v50 = vpop.permute.xlu2 %202 }
  0x7e   : > { %vm234_vm5 = vcmp.eq.s32.totalorder %v3354_v50, %v3352_v49  ;;  %vm236_vm8 = vcmp.eq.s32.totalorder %v3354_v50, %v3358_v51  ;;  %vm237_vm10 = vcmp.eq.s32.totalorder %v3354_v50, %v3361_v52  ;;  %vm235_vm13 = vcmp.eq.s32.totalorder %v3354_v50, %v3369_v53 }
  0x7f   : > { %vm2787_vm6 = vmpackc.low %vm234_vm5, %vm222_vm4  ;;  %vm226_vm4 = vcmp.eq.s32.totalorder %v3321_v38, %v3402_v59  ;;  %vm238_vm5 = vcmp.eq.s32.totalorder %v3354_v50, %v3402_v59  ;;  %vm242_vm2 = vcmp.eq.s32.totalorder %v3354_v50, %v3479_v16 }
  0x80   : > { %vm2803_vm11 = vmpackc.low %vm236_vm8, %vm224_vm7  ;;  %2788 = vmatmul.msk.bf16.vlgmr.msra.gmra.mxu0 %vm2787_vm6, %v4719_v54  ;;  %vm227_vm6 = vcmp.eq.s32.totalorder %v3321_v38, %v3405_v60 }
  0x81   : > { %2804 = vmatmul.msk.bf16.vlgmr.msra.gmra.mxu2 %vm2803_vm11, %v4719_v54  ;;  %vm2811_vm15 = vmpackc.low %vm237_vm10, %vm225_vm9  ;;  %vm239_vm10 = vcmp.eq.s32.totalorder %v3354_v50, %v3405_v60  ;;  %vm228_vm11 = vcmp.eq.s32.totalorder %v3321_v38, %v3408_v61 }
  0x82   : > { %2812 = vmatmul.msk.bf16.vlgmr.msra.gmra.mxu3 %vm2811_vm15, %v4719_v54  ;;  %vm2795_vm1 = vmpackc.low %vm235_vm13, %vm223_vm12  ;;  %vm240_vm13 = vcmp.eq.s32.totalorder %v3354_v50, %v3408_v61  ;;  %vm241_vm15 = vcmp.eq.s32.totalorder %v3354_v50, %v3411_v62 }
  0x83   : > { %2796 = vmatmul.msk.bf16.vlgmr.msra.gmra.mxu1 %vm2795_vm1, %v4719_v54  ;;  %vm3440_vm9 = vmpackc.low %vm238_vm5, %vm226_vm4 }
  0x84   : > { %vm3458_vm1 = vmpackc.low %vm239_vm10, %vm227_vm6 }
  0x85   : > { %v4734_v11 = vsel %vm3458_vm1, 4294967295, %v4733_v11  ;;  %vm3464_vm3 = vmpackc.low %vm240_vm13, %vm228_vm11  ;;  %vm1952_vm13 = vcmp.eq.s32.totalorder %v3221_v1, 4 }
  0x86   : > { %v4736_v12 = vsel %vm3464_vm3, 4294967295, %v4735_v12  ;;  %vm3468_vm4 = vmpackc.low %vm241_vm15, %vm229_vm14  ;;  %v3517_v23 = vsel %vm1952_vm13, 1, %v4723_v0  ;;  %vm245_vm13 = vcmp.eq.s32.totalorder %v3354_v50, %v3494_v19 }
  0x87   : > { %v4738_v13 = vsel %vm3468_vm4, 4294967295, %v4737_v13  ;;  %v3566_v35 = vsel %vm245_vm13, 1.0, %v3137_v31 }
  0x8c   : > { %v182_v7 = vpop.permute.xlu1 %181  ;;  %v178_v8 = vpop.permute.xlu0 %177 }
  0x8d   : > { %211 = vperm.xlu2 %3025, %v178_v8   ;;  %v2947_v8 = vld [vmem:[%s4714_s1 + $0x1f8] sm:$0xff] }
  0x8e   : > { %1504 = vmatpush.bf16.msrb.mxu3 %v2947_v8 }
  0x92   : > { %1505 = vmatpush.bf16.msrb.mxu3 %v2946_v22  ;;  %v2934_v22 = vld [vmem:[%s4714_s1 + $0x190] sm:$0xff] }
  0x94   : > { %v184_v17 = vpop.permute.xlu1 %183  ;;  %v180_v18 = vpop.permute.xlu0 %179 }
  0x95   : > { %220 = vperm.xlu0 %3026, %v184_v17   ;;  %217 = vperm.xlu2 %3025, %v182_v7   ;;  %v2923_v7 = vld [vmem:[%s4714_s1 + $0x138] sm:$0xff]  ;;  %v3482_v17 = vadd.s32 1152, %v3352_v49 }
  0x96   : > { %214 = vperm.xlu1 %3027, %v180_v18   ;;  %1417 = vmatpush.bf16.msrb.mxu0 %v2923_v7  ;;  %v3485_v18 = vadd.s32 1280, %v3352_v49 }
  0x97   : > { %1506 = vmatpush.bf16.msrb.mxu3 %v2945_v28 }
  0x9a   : > { %1418 = vmatpush.bf16.msrb.mxu0 %v2922_v21 }
  0x9b   : > { %1507 = vmatpush.bf16.msrb.mxu3 %v2944_v42 }
  0x9c   : > { %v3416_v5 = vpop.permute.xlu1 %208  ;;  %v3418_v6 = vpop.permute.xlu0 %205 }
  0x9d   : > { %3028 = vset.pattern.permute.xlu2 %v4717_v30  ;;  %3032 = vset.pattern.permute.xlu0 %v4721_v32  ;;  %vm248_vm7 = vcmp.eq.s32.totalorder %v3418_v6, %v3358_v51  ;;  %vm260_vm8 = vcmp.eq.s32.totalorder %v3416_v5, %v3358_v51  ;;  %vm249_vm5 = vcmp.eq.s32.totalorder %v3418_v6, %v3361_v52 }
  0x9e   : > { %3029 = vset.pattern.permute.xlu1 %v4717_v30  ;;  %1731 = vperm.xlu2 %3028, %v1726_v25   ;;  %vm2805_vm12 = vmpackc.low %vm260_vm8, %vm248_vm7  ;;  %vm261_vm6 = vcmp.eq.s32.totalorder %v3416_v5, %v3361_v52  ;;  %vm246_vm7 = vcmp.eq.s32.totalorder %v3418_v6, %v3352_v49  ;;  %vm258_vm10 = vcmp.eq.s32.totalorder %v3416_v5, %v3352_v49 }
  0x9f   : > { %1737 = vperm.xlu1 %3029, %v1728_v27   ;;  %1762 = vperm.xlu0 %3032, %v1728_v27   ;;  %vm2813_vm8 = vmpackc.low %vm261_vm6, %vm249_vm5  ;;  %vm247_vm11 = vcmp.eq.s32.totalorder %v3418_v6, %v3369_v53  ;;  %vm231_vm5 = vcmp.eq.s32.totalorder %v3321_v38, %v3482_v17  ;;  %vm243_vm6 = vcmp.eq.s32.totalorder %v3354_v50, %v3482_v17  ;;  %v4739_v27 = vmov 0 }
  0xa0   : > { %2806 = vmatmul.msk.bf16.gmra.mxu2 %vm2805_vm12, %v4719_v54  ;;  %vm259_vm12 = vcmp.eq.s32.totalorder %v3416_v5, %v3369_v53  ;;  %2814 = vmatmul.msk.bf16.gmra.mxu3 %vm2813_vm8, %v4719_v54  ;;  %vm2789_vm14 = vmpackc.low %vm258_vm10, %vm246_vm7  ;;  %vm232_vm8 = vcmp.eq.s32.totalorder %v3321_v38, %v3485_v18  ;;  %vm244_vm10 = vcmp.eq.s32.totalorder %v3354_v50, %v3485_v18  ;;  %v4751_v50 = vmov 0 }
  0xa1   : > { %2790 = vmatmul.msk.bf16.gmra.mxu0 %vm2789_vm14, %v4719_v54  ;;  %vm2797_vm15 = vmpackc.low %vm259_vm12, %vm247_vm11  ;;  %vm233_vm11 = vcmp.eq.s32.totalorder %v3321_v38, %v3494_v19  ;;  %vm1836_vm14 = vcmp.eq.s32.totalorder %v3224_v2, 2  ;;  %v2920_v38 = vld [vmem:[%s4714_s1 + $0x120] sm:$0xff]  ;;  %vm252_vm13 = vcmp.eq.s32.totalorder %v3418_v6, %v3408_v61 }
  0xa2   : > { %2798 = vmatmul.msk.bf16.gmra.mxu1 %vm2797_vm15, %v4719_v54  ;;  %vm3538_vm7 = vmpackc.low %vm242_vm2, %vm230_vm0  ;;  %v3559_v33 = vsel %vm233_vm11, 1.0, %v3137_v31  ;;  %vm2066_vm15 = vcmp.eq.s32.totalorder %v3221_v1, 6  ;;  %1419 = vmatpush.bf16.msrb.mxu0 %v2921_v26  ;;  %v3583_v40 = vsel %vm1836_vm14, 1, %v4723_v0  ;;  %vm1839_vm2 = vcmp.eq.s32.totalorder %v3230_v3, 2  ;;  %v2926_v26 = vld [vmem:[%s4714_s1 + $0x150] sm:$0xff] }
  0xa3   : > { %v4740_v27 = vsel %vm3538_vm7, 4294967295, %v4739_v27  ;;  %vm3552_vm12 = vmpackc.low %vm243_vm6, %vm231_vm5  ;;  %v3590_v41 = vsel %vm2066_vm15, 1, %v4723_v0  ;;  %vm250_vm5 = vcmp.eq.s32.totalorder %v3418_v6, %v3402_v59  ;;  %vm262_vm6 = vcmp.eq.s32.totalorder %v3416_v5, %v3402_v59  ;;  %1451 = vmatpush.bf16.msrb.mxu1 %v2926_v26 }
  0xa4   : > { %v4742_v29 = vsel %vm3552_vm12, 4294967295, %v4741_v29  ;;  %vm3572_vm0 = vmpackc.low %vm244_vm10, %vm232_vm8  ;;  %vm251_vm8 = vcmp.eq.s32.totalorder %v3418_v6, %v3405_v60  ;;  %vm263_vm10 = vcmp.eq.s32.totalorder %v3416_v5, %v3405_v60  ;;  %vm264_vm14 = vcmp.eq.s32.totalorder %v3416_v5, %v3408_v61 }
  0xa5   : > { %v4744_v36 = vsel %vm3572_vm0, 4294967295, %v4743_v36  ;;  %vm3610_vm11 = vmpackc.low %vm262_vm6, %vm250_vm5  ;;  %vm253_vm15 = vcmp.eq.s32.totalorder %v3418_v6, %v3411_v62  ;;  %vm265_vm0 = vcmp.eq.s32.totalorder %v3416_v5, %v3411_v62  ;;  %v3623_v45 = vsel %vm1839_vm2, 1, %v4723_v0 }
  0xa6   : > { %1740 = vperm.xlu2 %3028, %v1729_v37   ;;  %1420 = vmatpush.bf16.msrb.mxu0 %v2920_v38  ;;  %v4746_v44 = vsel %vm3610_vm11, 4294967295, %v4745_v44  ;;  %vm3625_vm12 = vmpackc.low %vm263_vm10, %vm251_vm8  ;;  %vm1894_vm2 = vcmp.eq.s32.totalorder %v3233_v4, 3  ;;  %vm1893_vm8 = vcmp.eq.s32.totalorder %v3224_v2, 3  ;;  %vm254_vm10 = vcmp.eq.s32.totalorder %v3418_v6, %v3479_v16  ;;  %v2941_v38 = vld [vmem:[%s4714_s1 + $0x1c8] sm:$0xff] }
  0xa7   : > { %3030 = vset.pattern.permute.xlu1 %v4721_v32  ;;  %1876 = vperm.xlu0 %3032, %v3396_v57   ;;  %v4748_v46 = vsel %vm3625_vm12, 4294967295, %v4747_v46  ;;  %vm3630_vm5 = vmpackc.low %vm264_vm14, %vm252_vm13  ;;  %vm255_vm13 = vcmp.eq.s32.totalorder %v3418_v6, %v3482_v17  ;;  %vm267_vm14 = vcmp.eq.s32.totalorder %v3416_v5, %v3482_v17  ;;  %vm4795_vm11 = vcmp.eq.s32.totalorder %v3230_v3, 4 }
  0xa8   : > { %1756 = vperm.xlu1 %3030, %v1726_v25   ;;  %v2937_v25 = vld [vmem:[%s4714_s1 + $0x1a8] sm:$0xff]  ;;  %v4750_v47 = vsel %vm3630_vm5, 4294967295, %v4749_v47  ;;  %vm3635_vm6 = vmpackc.low %vm265_vm0, %vm253_vm15  ;;  %vm266_vm0 = vcmp.eq.s32.totalorder %v3416_v5, %v3479_v16  ;;  %vm268_vm5 = vcmp.eq.s32.totalorder %v3416_v5, %v3485_v18 }
  0xa9   : > { %1477 = vmatpush.bf16.msrb.mxu2 %v2937_v25  ;;  %v4752_v50 = vsel %vm3635_vm6, 4294967295, %v4751_v50  ;;  %vm3654_vm15 = vmpackc.low %vm266_vm0, %vm254_vm10  ;;  %vm256_vm6 = vcmp.eq.s32.totalorder %v3418_v6, %v3485_v18  ;;  %vm257_vm10 = vcmp.eq.s32.totalorder %v3418_v6, %v3494_v19  ;;  %vm269_vm0 = vcmp.eq.s32.totalorder %v3416_v5, %v3494_v19  ;;  %v2935_v5 = vld [vmem:[%s4714_s1 + $0x198] sm:$0xff]  ;;  %v2942_v25 = vld [vmem:[%s4714_s1 + $0x1d0] sm:$0xff] }
  0xaa   : > { %vm3660_vm7 = vmpackc.low %vm267_vm14, %vm255_vm13  ;;  %v3678_v7 = vsel %vm257_vm10, 1.0, %v3137_v31  ;;  %v3681_v8 = vsel %vm269_vm0, 1.0, %v3137_v31  ;;  %1421 = vmatpush.bf16.msrb.mxu0 %v2919_v9 }
  0xad   : > { %1478 = vmatpush.bf16.msrb.mxu2 %v2936_v39  ;;  %v2917_v39 = vld [vmem:[%s4714_s1 + $0x108] sm:$0xff] }
  0xae   : > { %3031 = vset.pattern.permute.xlu2 %v4721_v32 }
  0xaf   : > { %1759 = vperm.xlu2 %3031, %v3350_v48   ;;  %1990 = vperm.xlu0 %3032, %v3517_v23  }
  0xb0   : > { %1765 = vperm.xlu1 %3030, %v1729_v37  }
  0xb1   : > { %1479 = vmatpush.bf16.msrb.mxu2 %v2935_v5  ;;  %v2924_v5 = vld [vmem:[%s4714_s1 + $0x140] sm:$0xff] }
  0xb5   : > { %1480 = vmatpush.bf16.msrb.mxu2 %v2934_v22 }
  0xb7   : > { %3033 = vset.pattern.permute.xlu2 %v4717_v30  ;;  %2104 = vperm.xlu0 %3032, %v3590_v41  }
  0xb8   : > { %3034 = vset.pattern.permute.xlu1 %v4717_v30  ;;  %1788 = vperm.xlu2 %3033, %v1783_v55  }
  0xb9   : > { %1791 = vperm.xlu1 %3034, %v1784_v56   ;;  %1481 = vmatpush.bf16.msrb.mxu2 %v2933_v34 }
  0xbd   : > { %1482 = vmatpush.bf16.msrb.mxu2 %v2932_v43 }
  0xbf   : > { %3057 = vset.pattern.permute.xlu0 %v4717_v30 }
  0xc0   : > { %1794 = vperm.xlu2 %3033, %v1785_v58   ;;  %1734 = vperm.xlu0 %3057, %v3350_v48   ;;  %v1898_v48 = vsel %vm1894_vm2, 1, %v4723_v0  ;;  %vm3673_vm2 = vmpackc.low %vm268_vm5, %vm256_vm6  ;;  %vm1896_vm5 = vcmp.eq.s32.totalorder %v3230_v3, 3  ;;  %vm1951_vm6 = vcmp.eq.s32.totalorder %v3233_v4, 4 }
  0xc1   : > { %3035 = vset.pattern.permute.xlu1 %v4721_v32  ;;  %v4758_v63 = vsel %vm3673_vm2, 4294967295, %v4757_v63  ;;  %v3751_v9 = vsel %vm1951_vm6, 1, %v4723_v0 }
  0xc2   : > { %1813 = vperm.xlu1 %3035, %v1783_v55  }
  0xc8   : > { %3036 = vset.pattern.permute.xlu2 %v4721_v32  ;;  %1797 = vperm.xlu0 %3057, %v3473_v14  }
  0xc9   : > { %1816 = vperm.xlu2 %3036, %v1784_v56   ;;  %v4753_v56 = vmov 0 }
  0xca   : > { %1819 = vperm.xlu1 %3035, %v1785_v58   ;;  %v4754_v56 = vsel %vm3654_vm15, 4294967295, %v4753_v56  ;;  %v4755_v58 = vmov 0 }
  0xcb   : > { %v4756_v58 = vsel %vm3660_vm7, 4294967295, %v4755_v58 }
  0xd0   : > { %1845 = vperm.xlu0 %3057, %v3583_v40  }
  0xd1   : > { %1822 = vperm.xlu2 %3036, %v3473_v14   ;;  %v2918_v14 = vld [vmem:[%s4714_s1 + $0x110] sm:$0xff] }
  0xd2   : > { %3037 = vset.pattern.permute.xlu1 %v4717_v30  ;;  %1422 = vmatpush.bf16.msrb.mxu0 %v2918_v14 }
  0xd3   : > { %1848 = vperm.xlu1 %3037, %v3476_v15  }
  0xd6   : > { %1423 = vmatpush.bf16.msrb.mxu0 %v2917_v39 }
  0xd8   : > { %1854 = vperm.xlu0 %3057, %v3623_v45  }
  0xd9   : > { %3038 = vset.pattern.permute.xlu2 %v4717_v30 }
  0xda   : > { %1851 = vperm.xlu2 %3038, %v3396_v57   ;;  %v1897_v57 = vsel %vm1893_vm8, 1, %v4723_v0  ;;  %vm1895_vm8 = vcmp.eq.s32.totalorder %v3221_v1, 3 }
  0xdb   : > { %3039 = vset.pattern.permute.xlu1 %v4721_v32  ;;  %v1899_v24 = vsel %vm1895_vm8, 1, %v4723_v0 }
  0xdc   : > { %1870 = vperm.xlu1 %3039, %v3583_v40   ;;  %v2925_v40 = vld [vmem:[%s4714_s1 + $0x148] sm:$0xff] }
  0xdd   : > { %1452 = vmatpush.bf16.msrb.mxu1 %v2925_v40  ;;  %v2955_v40 = vld [vmem:[%s4714_s1 + $0x238] sm:$0xff] }
  0xe1   : > { %1453 = vmatpush.bf16.msrb.mxu1 %v2924_v5 }
  0xe2   : > { %3040 = vset.pattern.permute.xlu2 %v4721_v32 }
  0xe3   : > { %1873 = vperm.xlu2 %3040, %v3476_v15   ;;  %v2943_v15 = vld [vmem:[%s4714_s1 + $0x1d8] sm:$0xff] }
  0xe4   : > { %1879 = vperm.xlu1 %3039, %v3623_v45   ;;  %1508 = vmatpush.bf16.msrb.mxu3 %v2943_v15  ;;  %v2940_v45 = vld [vmem:[%s4714_s1 + $0x1c0] sm:$0xff] }
  0xe5   : > { %v3758_v15 = vld [vmem:[%s4715_s2] sm:$0xff] }
  0xe6   : > { %v3871_v43 = vperm.slane %v3758_v15, 1 }
  0xe7   : > { %v3644_v55 = vpop.permute.xlu2 %211 }
  0xe8   : > { %1509 = vmatpush.bf16.msrb.mxu3 %v2942_v25  ;;  %vm270_vm13 = vcmp.eq.s32.totalorder %v3644_v55, %v3352_v49  ;;  %vm4759_vm6 = vcmp.eq.s32.totalorder %v3644_v55, %v3369_v53  ;;  %vm278_vm3 = vcmp.eq.s32.totalorder %v3644_v55, %v3479_v16 }
  0xeb   : > { %3041 = vset.pattern.permute.xlu2 %v4717_v30 }
  0xec   : > { %3042 = vset.pattern.permute.xlu1 %v4717_v30  ;;  %1902 = vperm.xlu2 %3041, %v1897_v57  }
  0xed   : > { %1905 = vperm.xlu1 %3042, %v1898_v48   ;;  %1510 = vmatpush.bf16.msrb.mxu3 %v2941_v38  ;;  %v2971_v38 = vld [vmem:[%s4714_s1 + $0x2b8] sm:$0xff] }
  0xee   : > { %1591 = vmatpush.bf16.msra.mxu2 %v2971_v38  ;;  %v2954_v38 = vld [vmem:[%s4714_s1 + $0x230] sm:$0xff] }
  0xef   : > { %v3700_v21 = vpop.permute.xlu2 %217 }
  0xf1   : > { %1511 = vmatpush.bf16.msrb.mxu3 %v2940_v45  ;;  %v2970_v45 = vld [vmem:[%s4714_s1 + $0x2b0] sm:$0xff] }
  0xf2   : > { %1592 = vmatpush.bf16.msra.mxu2 %v2970_v45 }
  0xf4   : > { %1908 = vperm.xlu2 %3041, %v1899_v24  }
  0xf5   : > { %3043 = vset.pattern.permute.xlu1 %v4721_v32 }
  0xf6   : > { %1927 = vperm.xlu1 %3043, %v1897_v57   ;;  %v1900_v57 = vsel %vm1896_vm5, 1, %v4723_v0 }
  0xf7   : > { %1911 = vperm.xlu0 %3057, %v1900_v57  }
  0xf8   : > { %v3717_v28 = vpop.permute.xlu2 %1731 }
  0xfc   : > { %3044 = vset.pattern.permute.xlu2 %v4721_v32 }
  0xfd   : > { %1930 = vperm.xlu2 %3044, %v1898_v48   ;;  %v2916_v48 = vld [vmem:[%s4714_s1 + $0x100] sm:$0xff] }
  0xfe   : > { %1933 = vperm.xlu1 %3043, %v1899_v24   ;;  %1424 = vmatpush.bf16.msrb.mxu0 %v2916_v48  ;;  %v3783_v24 = vperm.slane %v3758_v15, 0 }
 0x100   : > { %v3734_v42 = vpop.permute.xlu2 %1740 }
 0x102   : > { %1533 = vmatpush.bf16.msra.mxu0 %v2955_v40  ;;  %v4769_v40 = vmov 0 }
 0x105   : > { %1936 = vperm.xlu2 %3044, %v1900_v57  }
 0x106   : > { %3045 = vset.pattern.permute.xlu1 %v4717_v30  ;;  %1534 = vmatpush.bf16.msra.mxu0 %v2954_v38 }
 0x107   : > { %1962 = vperm.xlu1 %3045, %v3751_v9   ;;  %v3788_v14 = vpop.permute.xlu0 %220 }
 0x108   : > { %v3760_v20 = vpop.permute.xlu1 %214 }
 0x109   : > { %vm282_vm8 = vcmp.eq.s32.totalorder %v3760_v20, %v3352_v49  ;;  %vm283_vm5 = vcmp.eq.s32.totalorder %v3760_v20, %v3369_v53  ;;  %v3776_v22 = vpop.permute.xlu2 %1759  ;;  %vm4761_vm7 = vcmp.eq.s32.totalorder %v3760_v20, %v3358_v51  ;;  %vm287_vm10 = vcmp.eq.s32.totalorder %v3760_v20, %v3405_v60 }
 0x10a   : > { %vm2791_vm2 = vmpackc.low %vm282_vm8, %vm270_vm13  ;;  %vm1742_vm13 = vcmp.eq.s32.totalorder %v3717_v28, 1  ;;  %vm4765_vm8 = vcmp.eq.s32.totalorder %v3224_v2, 4  ;;  %v2963_v28 = vld [vmem:[%s4714_s1 + $0x278] sm:$0xff] }
 0x10b   : > { %2792 = vmatmul.msk.bf16.gmra.mxu0 %vm2791_vm2, %v4719_v54  ;;  %vm2799_vm14 = vmpackc.low %vm283_vm5, %vm4759_vm6  ;;  %vm4760_vm2 = vcmp.eq.s32.totalorder %v3644_v55, %v3358_v51  ;;  %vm294_vm6 = vcmp.eq.s32.totalorder %v3700_v21, %v3352_v49  ;;  %v1954_v26 = vsel %vm4765_vm8, 1, %v4723_v0  ;;  %v1747_v39 = vsel %vm1742_vm13, %v3783_v24, 0.0  ;;  %1562 = vmatpush.bf16.msra.mxu1 %v2963_v28 }
 0x10c   : > { %2800 = vmatmul.msk.bf16.gmra.mxu1 %vm2799_vm14, %v4719_v54  ;;  %vm2807_vm5 = vmpackc.low %vm4761_vm7, %vm4760_vm2  ;;  %vm4762_vm14 = vcmp.eq.s32.totalorder %v3644_v55, %v3494_v19  ;;  %vm4763_vm7 = vcmp.eq.s32.totalorder %v3644_v55, %v3361_v52  ;;  %vm4764_vm2 = vcmp.eq.s32.totalorder %v3760_v20, %v3361_v52  ;;  %vm1295_vm8 = vcmask 1040384   ;;  %1959 = vperm.xlu0 %3057, %v1954_v26  }
 0x10d   : > { %v3818_v25 = vsel %vm4762_vm14, 1.0, %v3137_v31  ;;  %2808 = vmatmul.msk.bf16.gmra.mxu2 %vm2807_vm5, %v4719_v54  ;;  %vm2815_vm0 = vmpackc.low %vm4764_vm2, %vm4763_vm7  ;;  %3046 = vset.pattern.permute.xlu2 %v4717_v30  ;;  %vm293_vm14 = vcmp.eq.s32.totalorder %v3760_v20, %v3494_v19  ;;  %vm4766_vm5 = vcmp.eq.s32.totalorder %v3700_v21, %v3494_v19  ;;  %vm306_vm7 = vcmp.eq.s32.totalorder %v3788_v14, %v3352_v49 }
 0x10e   : > { %v3839_v34 = vsel %vm4766_vm5, 1.0, %v3137_v31  ;;  %2816 = vmatmul.msk.bf16.gmra.mxu3 %vm2815_vm0, %v4719_v54  ;;  %1965 = vperm.xlu2 %3046, %v3517_v23   ;;  %vm286_vm0 = vcmp.eq.s32.totalorder %v3760_v20, %v3402_v59  ;;  %v738_v23 = vld [vmem:[%s4714_s1 + $0x2d0] sm:$0x1]  ;;  %v3882_v57 = vsel %vm293_vm14, 1.0, %v3137_v31  ;;  %vm4768_vm2 = vcmp.eq.s32.totalorder %v3644_v55, %v3402_v59  ;;  %vm3914_vm13 = vmpackc.low %vm306_vm7, %vm294_vm6 }
 0x10f   : > { %4767 = vst [vmem:[#allocation5_spill] sm:$0xff] %v3839_v34  ;;  %3047 = vset.pattern.permute.xlu1 %v4721_v32  ;;  %v1100_v48 = vunpack.c.l.b16 %v738_v23  ;;  %v2962_v23 = vld [vmem:[%s4714_s1 + $0x270] sm:$0xff]  ;;  %vm3898_vm14 = vmpackc.low %vm286_vm0, %vm4768_vm2  ;;  %vm317_vm5 = vcmp.eq.s32.totalorder %v3788_v14, %v3494_v19  ;;  %vm4773_vm2 = vcmp.eq.s32.totalorder %v3644_v55, %v3405_v60  ;;  %v4774_v19 = vmov 0 }
 0x110   : > { %1984 = vperm.xlu1 %3047, %v1954_v26   ;;  %v1297_v26 = vsel %vm1295_vm8, 65535, %v4723_v0  ;;  %v4770_v40 = vsel %vm3898_vm14, 4294967295, %v4769_v40  ;;  %vm3926_vm8 = vmpackc.low %vm287_vm10, %vm4773_vm2  ;;  %v3933_v49 = vsel %vm317_vm5, 1.0, %v3137_v31  ;;  %vm4776_vm7 = vcmp.eq.s32.totalorder %v3700_v21, %v3369_v53  ;;  %1563 = vmatpush.bf16.msra.mxu1 %v2962_v23 }
 0x111   : > { %v1738_v5 = vpop.permute.xlu1 %1737  ;;  %v1191_v30 = vpack.c.b16 %v1100_v48, %v1100_v48  ;;  %v4775_v19 = vsel %vm3926_vm8, 4294967295, %v4774_v19  ;;  %vm4777_vm0 = vcmp.eq.s32.totalorder %v3788_v14, %v3369_v53  ;;  %vm297_vm10 = vcmp.eq.s32.totalorder %v3700_v21, %v3361_v52  ;;  %v2973_v48 = vld [vmem:[%s4714_s1 + $0x2c8] sm:$0xff] }
 0x112   : > { %v1789_v37 = vpop.permute.xlu2 %1788  ;;  %vm3941_vm15 = vmpackc.low %vm4777_vm0, %vm4776_vm7  ;;  %vm4780_vm6 = vcmp.eq.s32.totalorder %v3644_v55, %v3408_v61  ;;  %vm4781_vm5 = vcmp.eq.s32.totalorder %v3760_v20, %v3408_v61  ;;  %v4782_v31 = vmov 0  ;;  %vm4784_vm7 = vcmp.eq.s32.totalorder %v3700_v21, %v3358_v51 }
 0x113   : > { %vm1799_vm2 = vcmp.eq.s32.totalorder %v1789_v37, 1  ;;  %vm3953_vm8 = vmpackc.low %vm4781_vm5, %vm4780_vm6  ;;  %vm4785_vm14 = vcmp.eq.s32.totalorder %v3788_v14, %v3358_v51  ;;  %v1299_v54 = vand.u32 %v1297_v26, %v1191_v30  ;;  %vm4788_vm6 = vcmp.eq.s32.totalorder %v3644_v55, %v3411_v62 }
 0x114   : > { %v4783_v31 = vsel %vm3953_vm8, 4294967295, %v4782_v31  ;;  %vm3967_vm12 = vmpackc.low %vm4785_vm14, %vm4784_vm7  ;;  %v1804_v28 = vsel %vm1799_vm2, %v3871_v43, 0.0  ;;  %vm4789_vm5 = vcmp.eq.s32.totalorder %v3760_v20, %v3411_v62  ;;  %v4790_v53 = vmov 0 }
 0x115   : > { %vm3978_vm0 = vmpackc.low %vm4789_vm5, %vm4788_vm6  ;;  %vm298_vm14 = vcmp.eq.s32.totalorder %v3700_v21, %v3402_v59  ;;  %vm4792_vm2 = vcmp.eq.s32.totalorder %v3788_v14, %v3361_v52  ;;  %v1957_v51 = vsel %vm4795_vm11, 1, %v4723_v0  ;;  %v3996_v45 = vadd.f32 %v1804_v28, %v1747_v39  ;;  %1625 = vmatpush.bf16.msra.mxu3 %v1299_v54  ;;  %v2961_v28 = vld [vmem:[%s4714_s1 + $0x268] sm:$0xff] }
 0x116   : > { %v4791_v53 = vsel %vm3978_vm0, 4294967295, %v4790_v53  ;;  %vm3989_vm8 = vmpackc.low %vm4792_vm2, %vm297_vm10  ;;  %vm4796_vm6 = vcmp.eq.s32.totalorder %v3788_v14, %v3402_v59  ;;  %v4797_v26 = vmov 0  ;;  %vm299_vm10 = vcmp.eq.s32.totalorder %v3700_v21, %v3405_v60  ;;  %3048 = vset.pattern.permute.xlu2 %v4721_v32  ;;  %1968 = vperm.xlu0 %3057, %v1957_v51  }
 0x117   : > { %vm4001_vm5 = vmpackc.low %vm4796_vm6, %vm298_vm14  ;;  %vm313_vm2 = vcmp.eq.s32.totalorder %v3788_v14, %v3411_v62  ;;  %vm4799_vm11 = vcmp.eq.s32.totalorder %v3788_v14, %v3405_v60  ;;  %v4800_v52 = vmov 0  ;;  %vm300_vm14 = vcmp.eq.s32.totalorder %v3700_v21, %v3408_v61  ;;  %1987 = vperm.xlu2 %3048, %v3751_v9   ;;  %1564 = vmatpush.bf16.msra.mxu1 %v2961_v28 }
 0x118   : > { %v4798_v26 = vsel %vm4001_vm5, 4294967295, %v4797_v26  ;;  %vm4013_vm7 = vmpackc.low %vm4799_vm11, %vm299_vm10  ;;  %vm290_vm6 = vcmp.eq.s32.totalorder %v3760_v20, %v3479_v16  ;;  %vm1744_vm5 = vcmp.eq.s32.totalorder %v1738_v5, 1  ;;  %vm4802_vm0 = vcmp.eq.s32.totalorder %v3788_v14, %v3408_v61  ;;  %1993 = vperm.xlu1 %3047, %v1957_v51  }
 0x119   : > { %v4801_v52 = vsel %vm4013_vm7, 4294967295, %v4800_v52  ;;  %vm4025_vm4 = vmpackc.low %vm4802_vm0, %vm300_vm14  ;;  %v4803_v54 = vmov 0  ;;  %vm301_vm10 = vcmp.eq.s32.totalorder %v3700_v21, %v3411_v62  ;;  %vm291_vm11 = vcmp.eq.s32.totalorder %v3760_v20, %v3482_v17  ;;  %1626 = vmatpush.bf16.msra.mxu3 %v2973_v48 }
 0x11a   : > { %v4804_v54 = vsel %vm4025_vm4, 4294967295, %v4803_v54  ;;  %vm4033_vm7 = vmpackc.low %vm313_vm2, %vm301_vm10  ;;  %vm292_vm0 = vcmp.eq.s32.totalorder %v3760_v20, %v3485_v18  ;;  %vm279_vm4 = vcmp.eq.s32.totalorder %v3644_v55, %v3482_v17  ;;  %v1749_v61 = vsel %vm1744_vm5, %v3783_v24, 0.0  ;;  %v4051_v62 = vpop.permute.xlu1 %1756  ;;  %v1795_v9 = vpop.permute.xlu2 %1794 }
 0x11b   : > { %vm4041_vm14 = vmpackc.low %vm290_vm6, %vm278_vm3  ;;  %vm280_vm3 = vcmp.eq.s32.totalorder %v3644_v55, %v3485_v18  ;;  %vm315_vm6 = vcmp.eq.s32.totalorder %v3788_v14, %v3482_v17  ;;  %v4811_v20 = vmov 1.0|1.0   ;;  %vm2008_vm5 = vcmp.eq.s32.totalorder %v3233_v4, 5 }
 0x11c   : > { %vm4053_vm10 = vmpackc.low %vm291_vm11, %vm279_vm4  ;;  %2794 = vmatmul.msk.bf16.gmra.mxu0 %vm3914_vm13, %v4811_v20  ;;  %vm1801_vm2 = vcmp.eq.s32.totalorder %v1795_v9, 1  ;;  %vm302_vm4 = vcmp.eq.s32.totalorder %v3700_v21, %v3479_v16  ;;  %2802 = vmatmul.msk.bf16.gmra.mxu1 %vm3941_vm15, %v4811_v20  ;;  %vm4814_vm11 = vcmp.eq.s32.totalorder %v3788_v14, %v3479_v16  ;;  %v2012_v16 = vsel %vm2008_vm5, 1, %v4723_v0 }
 0x11d   : > { %vm4065_vm1 = vmpackc.low %vm292_vm0, %vm280_vm3  ;;  %v1806_v55 = vsel %vm1801_vm2, %v3871_v43, 0.0  ;;  %vm303_vm0 = vcmp.eq.s32.totalorder %v3700_v21, %v3482_v17  ;;  %2810 = vmatmul.msk.bf16.gmra.mxu2 %vm3967_vm12, %v4811_v20  ;;  %vm4817_vm3 = vcmp.eq.s32.totalorder %v3224_v2, 5  ;;  %vm316_vm2 = vcmp.eq.s32.totalorder %v3788_v14, %v3485_v18  ;;  %v2969_v2 = vld [vmem:[%s4714_s1 + $0x2a8] sm:$0xff] }
 0x11e   : > { %vm4078_vm13 = vmpackc.low %vm4814_vm11, %vm302_vm4  ;;  %v2011_v4 = vsel %vm4817_vm3, 1, %v4723_v0  ;;  %v4090_v38 = vadd.f32 %v1806_v55, %v1749_v61  ;;  %2818 = vmatmul.msk.bf16.gmra.mxu3 %vm3989_vm8, %v4811_v20  ;;  %v2953_v17 = vld [vmem:[%s4714_s1 + $0x228] sm:$0xff]  ;;  %vm2010_vm12 = vcmp.eq.s32.totalorder %v3230_v3, 5  ;;  %v4820_v14 = vmov 1   ;;  %1593 = vmatpush.bf16.msra.mxu2 %v2969_v2  ;;  %v2968_v3 = vld [vmem:[%s4714_s1 + $0x2a0] sm:$0xff] }
 0x11f   : > { %vm4092_vm15 = vmpackc.low %vm315_vm6, %vm303_vm0  ;;  %3049 = vset.pattern.permute.xlu2 %v4820_v14  ;;  %vm304_vm8 = vcmp.eq.s32.totalorder %v3700_v21, %v3485_v18  ;;  %vm1768_vm6 = vcmp.eq.s32.totalorder %v3776_v22, 1  ;;  %v4121_v37 = vsel %vm2010_vm12, 1, %v4723_v0  ;;  %vm2009_vm4 = vcmp.eq.s32.totalorder %v3221_v1, 5  ;;  %1535 = vmatpush.bf16.msra.mxu0 %v2953_v17  ;;  %v2952_v21 = vld [vmem:[%s4714_s1 + $0x220] sm:$0xff] }
 0x120   : > { %3050 = vset.pattern.permute.xlu1 %v4820_v14  ;;  %2016 = vperm.xlu2 %3049, %v2011_v4   ;;  %vm4123_vm5 = vmpackc.low %vm316_vm2, %vm304_vm8  ;;  %v2960_v22 = vld [vmem:[%s4714_s1 + $0x260] sm:$0xff]  ;;  %v1772_v51 = vsel %vm1768_vm6, %v3783_v24, 0.0  ;;  %v2013_v1 = vsel %vm2009_vm4, 1, %v4723_v0  ;;  %vm4823_vm2 = vnez %v4734_v11  ;;  %vm4824_vm8 = vnez %v4736_v12  ;;  %v2951_v11 = vld [vmem:[%s4714_s1 + $0x218] sm:$0xff] }
 0x121   : > { %2019 = vperm.xlu1 %3050, %v2012_v16   ;;  %2025 = vperm.xlu0 %3057, %v4121_v37   ;;  %v4142_v55 = vld [vmem:[%s3218_s28] sm:$0xff]  ;;  %v2959_v12 = vld [vmem:[%s4714_s1 + $0x258] sm:$0xff]  ;;  %vm1767_vm4 = vcmp.eq.s32.totalorder %v4051_v62, 1  ;;  %v4347_v59 = vperm.slane %v3758_v15, 4  ;;  %v4851_v39 = vpack.c.bf16 %v3882_v57, %v3818_v25 }
 0x122   : > { %v1766_v18 = vpop.permute.xlu1 %1765  ;;  %1594 = vmatpush.bf16.msra.mxu2 %v2968_v3  ;;  %vm2064_vm0 = vcmp.eq.s32.totalorder %v4142_v55, 6  ;;  %1565 = vmatpush.bf16.msra.mxu1 %v2960_v22  ;;  %v2966_v22 = vld [vmem:[%s4714_s1 + $0x290] sm:$0xff]  ;;  %v1771_v62 = vsel %vm1767_vm4, %v3783_v24, 0.0  ;;  %vm4831_vm4 = vnez %v4752_v50 }
 0x123   : > { %v1817_v61 = vpop.permute.xlu2 %1816  ;;  %1536 = vmatpush.bf16.msra.mxu0 %v2952_v21  ;;  %vm1770_vm3 = vcmp.eq.s32.totalorder %v1766_v18, 1  ;;  %v4148_v17 = vsel %vm2064_vm0, 1, %v4723_v0  ;;  %v2967_v18 = vld [vmem:[%s4714_s1 + $0x298] sm:$0xff] }
 0x124   : > { %vm1825_vm11 = vcmp.eq.s32.totalorder %v1817_v61, 1  ;;  %v1774_v28 = vsel %vm1770_vm3, %v3783_v24, 0.0  ;;  %v4180_v21 = vld [vmem:[%s3218_s28 + $0x18] sm:$0xff]  ;;  %v2950_v61 = vld [vmem:[%s4714_s1 + $0x210] sm:$0xff] }
 0x125   : > { %v1829_v9 = vsel %vm1825_vm11, %v3871_v43, 0.0  ;;  %4826 = vst [vmem:[#allocation6_spill] sm:$0xff] %v4180_v21  ;;  %vm2067_vm6 = vcmp.eq.s32.totalorder %v4180_v21, 6 }
 0x126   : > { %v4145_v2 = vadd.f32 %v1829_v9, %v1772_v51  ;;  %1595 = vmatpush.bf16.msra.mxu2 %v2967_v18  ;;  %v2972_v51 = vld [vmem:[%s4714_s1 + $0x2c0] sm:$0xff]  ;;  %v1310_v9 = vpop.f32.mrf.mxu0  ;;  %1566 = vmatpush.bf16.msra.mxu1 %v2959_v12  ;;  %v1368_v12 = vpop.f32.mrf.mxu2 }
 0x127   : > { %1537 = vmatpush.bf16.msra.mxu0 %v2951_v11  ;;  %1627 = vmatpush.bf16.msra.mxu3 %v2972_v51 }
 0x128   : > { %2022 = vperm.xlu2 %3049, %v2013_v1  }
 0x129   : > { %3051 = vset.pattern.permute.xlu1 %v4721_v32  ;;  %2073 = vperm.xlu0 %3057, %v4148_v17  }
 0x12a   : > { %2041 = vperm.xlu1 %3051, %v2011_v4   ;;  %1596 = vmatpush.bf16.msra.mxu2 %v2966_v22  ;;  %v4827_v22 = vmov 0  }
 0x12b   : > { %v4155_v48 = vpop.permute.xlu1 %1791  ;;  %v1823_v3 = vpop.permute.xlu2 %1822  ;;  %1538 = vmatpush.bf16.msra.mxu0 %v2950_v61 }
 0x12c   : > { %2820 = vmatmul.msk.bf16.vlgmr.msrb.gmra.mxu0 %vm3440_vm9, %v4811_v20  ;;  %2828 = vmatmul.msk.bf16.vlgmr.msrb.gmra.mxu1 %vm4823_vm2, %v4811_v20  ;;  %vm1827_vm12 = vcmp.eq.s32.totalorder %v1823_v3, 1  ;;  %vm4825_vm9 = vnez %v4738_v13  ;;  %v4185_v13 = vsel %vm2067_vm6, 1, %v4723_v0  ;;  %v4198_v3 = vperm.slane %v3758_v15, 2  ;;  %v1397_v61 = vpop.f32.mrf.mxu3 }
 0x12d   : > { %2836 = vmatmul.msk.bf16.vlgmr.msrb.gmra.mxu2 %vm4824_vm8, %v4811_v20  ;;  %v1831_v4 = vsel %vm1827_vm12, %v3871_v43, 0.0  ;;  %vm4828_vm12 = vnez %v4746_v44  ;;  %vm4829_vm8 = vnez %v4748_v46  ;;  %v2965_v46 = vld [vmem:[%s4714_s1 + $0x288] sm:$0xff] }
 0x12e   : > { %2844 = vmatmul.msk.bf16.vlgmr.msrb.gmra.mxu3 %vm4825_vm9, %v4811_v20  ;;  %v4168_v10 = vadd.f32 %v1831_v4, %v1774_v28  ;;  %v1339_v28 = vpop.f32.mrf.mxu1  ;;  %v2958_v4 = vld [vmem:[%s4714_s1 + $0x250] sm:$0xff]  ;;  %vm4830_vm9 = vnez %v4750_v47  ;;  %v2957_v47 = vld [vmem:[%s4714_s1 + $0x248] sm:$0xff]  ;;  %1597 = vmatpush.bf16.msra.mxu2 %v2965_v46 }
 0x12f   : > { %v1340_v18 = vadd.f32 %v1339_v28, %v1310_v9  ;;  %1567 = vmatpush.bf16.msra.mxu1 %v2958_v4  ;;  %v2949_v4 = vld [vmem:[%s4714_s1 + $0x208] sm:$0xff] }
 0x130   : > { %3052 = vset.pattern.permute.xlu2 %v4721_v32  ;;  %v4206_v32 = vld [vmem:[%s3218_s28 + $0x8] sm:$0xff]  ;;  %1539 = vmatpush.bf16.msra.mxu0 %v2949_v4 }
 0x131   : > { %2044 = vperm.xlu2 %3052, %v2012_v16   ;;  %2082 = vperm.xlu0 %3057, %v4185_v13   ;;  %vm2065_vm11 = vcmp.eq.s32.totalorder %v4206_v32, 6  ;;  %v1369_v51 = vadd.f32 %v1368_v12, %v1340_v18  ;;  %v1312_v18 = vpop.f32.mrf.mxu0 }
 0x132   : > { %2047 = vperm.xlu1 %3051, %v2013_v1   ;;  %v1763_v1 = vpop.permute.xlu0 %1762  ;;  %v2069_v34 = vsel %vm2065_vm11, 1, %v4827_v22 }
 0x133   : > { %vm1769_vm2 = vcmp.eq.s32.totalorder %v1763_v1, 1  ;;  %1568 = vmatpush.bf16.msra.mxu1 %v2957_v47 }
 0x134   : > { %v1814_v16 = vpop.permute.xlu1 %1813  ;;  %v1852_v11 = vpop.permute.xlu2 %1851 }
 0x135   : > { %vm1824_vm0 = vcmp.eq.s32.totalorder %v1814_v16, 1  ;;  %vm1858_vm3 = vcmp.eq.s32.totalorder %v1852_v11, 1  ;;  %v4243_v16 = vadd.f32 %v1397_v61, %v1369_v51  ;;  %v4832_v61 = vmov 3  }
 0x136   : > { %v1828_v0 = vsel %vm1824_vm0, %v3871_v43, 0.0  ;;  %v1863_v9 = vsel %vm1858_vm3, %v4198_v3, 0.0  ;;  %v1341_v11 = vpop.f32.mrf.mxu1  ;;  %vm4833_vm3 = vnez %v4770_v40 }
 0x137   : > { %v4211_v28 = vadd.f32 %v1828_v0, %v1771_v62  ;;  %v4214_v21 = vadd.f32 %v1863_v9, %v4090_v38  ;;  %v1773_v38 = vsel %vm1769_vm2, %v3783_v24, 0.0  ;;  %v1342_v9 = vadd.f32 %v1341_v11, %v1312_v18  ;;  %v1399_v18 = vpop.f32.mrf.mxu3 }
 0x138   : > { %vm4834_vm2 = vnez %v4775_v19 }
 0x139   : > { %2050 = vperm.xlu2 %3052, %v4121_v37   ;;  %v1315_v19 = vpop.f32.mrf.mxu0 }
 0x13a   : > { %3053 = vset.pattern.permute.xlu1 %v4820_v14  ;;  %v1877_v1 = vpop.permute.xlu0 %1876 }
 0x13b   : > { %2076 = vperm.xlu1 %3053, %v2069_v34   ;;  %vm1883_vm0 = vcmp.eq.s32.totalorder %v1877_v1, 1 }
 0x13c   : > { %2822 = vmatmul.msk.bf16.gmra.mxu0 %vm4828_vm12, %v4811_v20  ;;  %2830 = vmatmul.msk.bf16.gmra.mxu1 %vm4829_vm8, %v4811_v20  ;;  %v1820_v0 = vpop.permute.xlu1 %1819  ;;  %v1887_v51 = vsel %vm1883_vm0, %v4198_v3, 0.0  ;;  %vm4835_vm12 = vnez %v4783_v31  ;;  %vm4836_vm8 = vnez %v4791_v53  ;;  %vm1800_vm0 = vcmp.eq.s32.totalorder %v4155_v48, 1 }
 0x13d   : > { %2838 = vmatmul.msk.bf16.gmra.mxu2 %vm4830_vm9, %v4811_v20  ;;  %vm1826_vm6 = vcmp.eq.s32.totalorder %v1820_v0, 1  ;;  %v1874_v37 = vpop.permute.xlu2 %1873  ;;  %v1370_v0 = vpop.f32.mrf.mxu2  ;;  %vm2121_vm9 = vcmp.eq.s32.totalorder %v4142_v55, 7 }
 0x13e   : > { %2846 = vmatmul.msk.bf16.gmra.mxu3 %vm4831_vm4, %v4811_v20  ;;  %v1830_v44 = vsel %vm1826_vm6, %v3871_v43, 0.0  ;;  %vm1882_vm11 = vcmp.eq.s32.totalorder %v1874_v37, 1  ;;  %v2964_v37 = vld [vmem:[%s4714_s1 + $0x280] sm:$0xff]  ;;  %v1371_v46 = vadd.f32 %v1370_v0, %v1342_v9  ;;  %v4294_v53 = vsel %vm2121_vm9, 1, %v4827_v22 }
 0x13f   : > { %v1886_v50 = vsel %vm1882_vm11, %v4198_v3, 0.0  ;;  %v1834_v62 = vadd.f32 %v1830_v44, %v1773_v38  ;;  %v2948_v38 = vld [vmem:[%s4714_s1 + $0x200] sm:$0xff]  ;;  %1598 = vmatpush.bf16.msra.mxu2 %v2964_v37  ;;  %vm2122_vm11 = vcmp.eq.s32.totalorder %v4206_v32, 7 }
 0x140   : > { %v4246_v12 = vadd.f32 %v1886_v50, %v4145_v2  ;;  %v2956_v2 = vld [vmem:[%s4714_s1 + $0x240] sm:$0xff]  ;;  %1540 = vmatpush.bf16.msra.mxu0 %v2948_v38  ;;  %v4266_v50 = vadd.f32 %v1399_v18, %v1371_v46  ;;  %v4303_v0 = vsel %vm2122_vm11, 1, %v4827_v22  ;;  %v3066_v38 = vld [vmem:[%s3218_s28 + $0x10] sm:$0xff]  ;;  %v1805_v18 = vsel %vm1800_vm0, %v3871_v43, 0.0  ;;  %s3138_s28 = smov 64  }
 0x141   : > { %3054 = vset.pattern.permute.xlu2 %v4820_v14  ;;  %v4260_v44 = vadd.f32 %v1887_v51, %v1834_v62  ;;  %1569 = vmatpush.bf16.msra.mxu1 %v2956_v2  ;;  %v1344_v62 = vpop.f32.mrf.mxu1  ;;  %v1402_v51 = vpop.f32.mrf.mxu3  ;;  %vm1745_vm11 = vcmp.eq.s32.totalorder %v3734_v42, 1  ;;  %vm4840_vm0 = vnez %v4804_v54 }
 0x142   : > { %2079 = vperm.xlu2 %3054, %v3590_v41   ;;  %v4268_v11 = vpop.permute.xlu0 %1990  ;;  %v4279_v41 = vperm.slane %v3758_v15, 3  ;;  %v1345_v32 = vadd.f32 %v1344_v62, %v1315_v19  ;;  %v1317_v46 = vpop.f32.mrf.mxu0 }
 0x143   : > { %3055 = vset.pattern.permute.xlu1 %v4832_v61 }
 0x144   : > { %2098 = vperm.xlu1 %3055, %v4148_v17  }
 0x145   : > { %v1849_v4 = vpop.permute.xlu1 %1848  ;;  %v1373_v1 = vpop.f32.mrf.mxu2 }
 0x146   : > { %v4264_v47 = vpop.permute.xlu2 %1902  ;;  %v1374_v37 = vadd.f32 %v1373_v1, %v1345_v32 }
 0x149   : > { %v1346_v48 = vpop.f32.mrf.mxu1 }
 0x14a   : > { %3056 = vset.pattern.permute.xlu2 %v4832_v61  ;;  %v4289_v17 = vpop.permute.xlu0 %2104 }
 0x14b   : > { %2101 = vperm.xlu2 %3056, %v2069_v34  }
 0x14c   : > { %2824 = vmatmul.msk.bf16.gmra.mxu0 %vm4833_vm3, %v4811_v20  ;;  %2832 = vmatmul.msk.bf16.gmra.mxu1 %vm4834_vm2, %v4811_v20  ;;  %vm2123_vm3 = vcmp.eq.s32.totalorder %v3066_v38, 7  ;;  %vm1857_vm2 = vcmp.eq.s32.totalorder %v1849_v4, 1 }
 0x14d   : > { %2107 = vperm.xlu1 %3055, %v4185_v13   ;;  %2840 = vmatmul.msk.bf16.gmra.mxu2 %vm4835_vm12, %v4811_v20  ;;  %v1375_v4 = vpop.f32.mrf.mxu2  ;;  %v1862_v62 = vsel %vm1857_vm2, %v4198_v3, 0.0 }
 0x14e   : > { %2848 = vmatmul.msk.bf16.gmra.mxu3 %vm4836_vm8, %v4811_v20  ;;  %v1871_v34 = vpop.permute.xlu1 %1870  ;;  %v1909_v40 = vpop.permute.xlu2 %1908 }
 0x14f   : > { %vm1881_vm6 = vcmp.eq.s32.totalorder %v1871_v34, 1  ;;  %vm1915_vm4 = vcmp.eq.s32.totalorder %v1909_v40, 1  ;;  %v4315_v34 = vsel %vm2123_vm3, 1, %v4827_v22 }
 0x150   : > { %v1885_v13 = vsel %vm1881_vm6, %v4198_v3, 0.0  ;;  %v1920_v31 = vsel %vm1915_vm4, %v4279_v41, 0.0  ;;  %4837 = vst [vmem:[#allocation7_spill] sm:$0xff] %v4315_v34  ;;  %vm4838_vm6 = vnez %v4798_v26  ;;  %vm4839_vm4 = vnez %v4801_v52  ;;  %v1404_v26 = vpop.f32.mrf.mxu3 }
 0x151   : > { %v4297_v55 = vadd.f32 %v1885_v13, %v4211_v28  ;;  %v4300_v9 = vadd.f32 %v1920_v31, %v4214_v21  ;;  %v4311_v21 = vadd.f32 %v1402_v51, %v1374_v37  ;;  %v1347_v31 = vadd.f32 %v1346_v48, %v1317_v46 }
 0x152   : > { %v1735_v40 = vpop.permute.xlu0 %1734 }
 0x153   : > { %3058 = vset.pattern.permute.xlu2 %v4820_v14  ;;  %vm1743_vm9 = vcmp.eq.s32.totalorder %v1735_v40, 1  ;;  %v1376_v51 = vadd.f32 %v1375_v4, %v1347_v31 }
 0x154   : > { %2130 = vperm.xlu2 %3058, %v4294_v53   ;;  %v1748_v32 = vsel %vm1743_vm9, %v3783_v24, 0.0  ;;  %vm4841_vm9 = vnez %v4740_v27 }
 0x155   : > { %3059 = vset.pattern.permute.xlu1 %v4820_v14  ;;  %v1809_v37 = vadd.f32 %v1805_v18, %v1748_v32  ;;  %v4338_v52 = vadd.f32 %v1404_v26, %v1376_v51 }
 0x156   : > { %2133 = vperm.xlu1 %3059, %v4303_v0   ;;  %v1880_v28 = vpop.permute.xlu1 %1879 }
 0x157   : > { %vm1884_vm12 = vcmp.eq.s32.totalorder %v1880_v28, 1  ;;  %v1931_v2 = vpop.permute.xlu2 %1930  ;;  %v1750_v28 = vsel %vm1745_vm11, %v3783_v24, 0.0  ;;  %vm4844_vm11 = vnez %v4744_v36 }
 0x158   : > { %v1888_v14 = vsel %vm1884_vm12, %v4198_v3, 0.0  ;;  %vm1939_vm8 = vcmp.eq.s32.totalorder %v1931_v2, 1 }
 0x159   : > { %v1892_v19 = vadd.f32 %v1888_v14, %v4168_v10  ;;  %v1943_v13 = vsel %vm1939_vm8, %v4279_v41, 0.0  ;;  %v1866_v10 = vadd.f32 %v1862_v62, %v1809_v37  ;;  %v4845_v62 = vpack.c.bf16 %v3566_v35, %v3559_v33 }
 0x15a   : > { %v1947_v1 = vadd.f32 %v1943_v13, %v4246_v12  ;;  %v1798_v42 = vpop.permute.xlu0 %1797 }
 0x15b   : > { %vm1802_vm2 = vcmp.eq.s32.totalorder %v1798_v42, 1 }
 0x15c   : > { %2826 = vmatmul.msk.bf16.gmra.mxu0 %vm4838_vm6, %v4811_v20  ;;  %2834 = vmatmul.msk.bf16.gmra.mxu1 %vm4839_vm4, %v4811_v20  ;;  %v1807_v46 = vsel %vm1802_vm2, %v3871_v43, 0.0  ;;  %vm1282_vm6 = vcmask 269312   ;;  %vm4843_vm4 = vnez %v4742_v29 }
 0x15d   : > { %2136 = vperm.xlu2 %3058, %v4315_v34   ;;  %2842 = vmatmul.msk.bf16.gmra.mxu2 %vm4840_vm0, %v4811_v20  ;;  %v1811_v18 = vadd.f32 %v1807_v46, %v1750_v28 }
 0x15e   : > { %3060 = vset.pattern.permute.xlu1 %v4832_v61  ;;  %2850 = vmatmul.msk.bf16.gmra.mxu3 %vm4033_vm7, %v4811_v20 }
 0x15f   : > { %v1906_v12 = vpop.permute.xlu1 %1905  ;;  %v1937_v38 = vpop.permute.xlu2 %1936 }
 0x160   : > { %vm1941_vm3 = vcmp.eq.s32.totalorder %v1937_v38, 1  ;;  %vm1914_vm12 = vcmp.eq.s32.totalorder %v1906_v12, 1  ;;  %v4850_v38 = vpack.c.bf16 %v3681_v8, %v3678_v7 }
 0x161   : > { %v1945_v2 = vsel %vm1941_vm3, %v4279_v41, 0.0  ;;  %v1919_v14 = vsel %vm1914_vm12, %v4279_v41, 0.0 }
 0x162   : > { %v4342_v54 = vadd.f32 %v1945_v2, %v1892_v19  ;;  %v1846_v13 = vpop.permute.xlu0 %1845  ;;  %v1923_v31 = vadd.f32 %v1919_v14, %v1866_v10 }
 0x163   : > { %vm1856_vm12 = vcmp.eq.s32.totalorder %v1846_v13, 1 }
 0x165   : > { %3061 = vset.pattern.permute.xlu2 %v4832_v61 }
 0x168   : > { %v1928_v48 = vpop.permute.xlu1 %1927  ;;  %v1966_v24 = vpop.permute.xlu2 %1965 }
 0x169   : > { %vm1938_vm7 = vcmp.eq.s32.totalorder %v1928_v48, 1  ;;  %vm1972_vm8 = vcmp.eq.s32.totalorder %v1966_v24, 1 }
 0x16a   : > { %v1942_v40 = vsel %vm1938_vm7, %v4279_v41, 0.0  ;;  %v1977_v19 = vsel %vm1972_vm8, %v4347_v59, 0.0  ;;  %v1855_v37 = vpop.permute.xlu0 %1854  ;;  %vm4846_vm8 = vnez %v4754_v56 }
 0x16b   : > { %v1946_v43 = vadd.f32 %v1942_v40, %v4297_v55  ;;  %v4357_v4 = vadd.f32 %v1977_v19, %v4300_v9  ;;  %vm1859_vm2 = vcmp.eq.s32.totalorder %v1855_v37, 1 }
 0x16c   : > { %2852 = vmatmul.msk.bf16.vlgmr.msra.gmra.mxu0 %vm4841_vm9, %v4811_v20  ;;  %2860 = vmatmul.msk.bf16.vlgmr.msra.gmra.mxu1 %vm4843_vm4, %v4811_v20  ;;  %v1864_v36 = vsel %vm1859_vm2, %v4198_v3, 0.0  ;;  %vm4847_vm9 = vnez %v4756_v58 }
 0x16d   : > { %4842 = vst [vmem:[#allocation8_spill] sm:$0xff] %v4357_v4  ;;  %2868 = vmatmul.msk.bf16.vlgmr.msra.gmra.mxu2 %vm4844_vm11, %v4811_v20  ;;  %v1868_v10 = vadd.f32 %v1864_v36, %v1811_v18  ;;  %vm1913_vm11 = vcmp.eq.s32.totalorder %v4264_v47, 1 }
 0x16e   : > { %2875 = vmatmul.msk.bf16.vlgmr.msra.gmra.mxu3 %vm1282_vm6, %v4845_v62 }
 0x170   : > { %v1934_v27 = vpop.permute.xlu1 %1933 }
 0x171   : > { %vm1940_vm0 = vcmp.eq.s32.totalorder %v1934_v27, 1  ;;  %v1988_v32 = vpop.permute.xlu2 %1987 }
 0x172   : > { %v1944_v55 = vsel %vm1940_vm0, %v4279_v41, 0.0  ;;  %vm1996_vm3 = vcmp.eq.s32.totalorder %v1988_v32, 1  ;;  %v1912_v26 = vpop.permute.xlu0 %1911  ;;  %vm4849_vm0 = vnez %v4758_v63 }
 0x173   : > { %v4371_v9 = vadd.f32 %v1944_v55, %v4260_v44  ;;  %v2000_v29 = vsel %vm1996_vm3, %v4347_v59, 0.0  ;;  %vm1916_vm4 = vcmp.eq.s32.totalorder %v1912_v26, 1 }
 0x174   : > { %v2004_v51 = vadd.f32 %v2000_v29, %v1947_v1  ;;  %v1861_v1 = vsel %vm1856_vm12, %v4198_v3, 0.0  ;;  %v1921_v56 = vsel %vm1916_vm4, %v4279_v41, 0.0  ;;  %v1918_v3 = vsel %vm1913_vm11, %v4279_v41, 0.0 }
 0x175   : > { %v1925_v58 = vadd.f32 %v1921_v56, %v1868_v10  ;;  %v1865_v28 = vadd.f32 %v1861_v1, %v3996_v45  ;;  %v4409_v45 = vperm.slane %v3758_v15, 5 }
 0x177   : > { %v4402_v63 = vadd.f32 %v1918_v3, %v1865_v28 }
 0x179   : > { %v1963_v33 = vpop.permute.xlu1 %1962 }
 0x17a   : > { %vm1971_vm7 = vcmp.eq.s32.totalorder %v1963_v33, 1  ;;  %v4375_v35 = vpop.permute.xlu2 %2016 }
 0x17b   : > { %v1976_v44 = vsel %vm1971_vm7, %v4347_v59, 0.0  ;;  %vm2027_vm11 = vcmp.eq.s32.totalorder %v4375_v35, 1 }
 0x17c   : > { %2854 = vmatmul.msk.bf16.gmra.mxu0 %vm4846_vm8, %v4811_v20  ;;  %2862 = vmatmul.msk.bf16.gmra.mxu1 %vm4847_vm9, %v4811_v20  ;;  %v4385_v12 = vadd.f32 %v1976_v44, %v1923_v31  ;;  %vm1997_vm8 = vcmp.eq.s32.totalorder %v4268_v11, 1  ;;  %vm2111_vm9 = vcmp.eq.s32.totalorder %v4289_v17, 1 }
 0x17d   : > { %2870 = vmatmul.msk.bf16.gmra.mxu2 %vm4849_vm0, %v4811_v20  ;;  %v2001_v62 = vsel %vm1997_vm8, %v4347_v59, 0.0 }
 0x17e   : > { %4848 = vst [vmem:[#allocation9_spill] sm:$0xff] %v4385_v12  ;;  %2876 = vmatmul.msk.bf16.gmra.mxu3 %vm1282_vm6, %v4850_v38  ;;  %v4400_v47 = vpop.permute.xlu0 %1959  ;;  %v2005_v10 = vadd.f32 %v2001_v62, %v4371_v9 }
 0x17f   : > { %vm1970_vm4 = vcmp.eq.s32.totalorder %v4400_v47, 1 }
 0x182   : > { %v1985_v42 = vpop.permute.xlu1 %1984  ;;  %v4398_v2 = vpop.permute.xlu2 %2022 }
 0x183   : > { %vm1995_vm3 = vcmp.eq.s32.totalorder %v1985_v42, 1 }
 0x184   : > { %v1999_v46 = vsel %vm1995_vm3, %v4347_v59, 0.0 }
 0x185   : > { %v2003_v18 = vadd.f32 %v1999_v46, %v1946_v43  ;;  %v4854_v46 = vld [vmem:[#allocation5_spill] sm:$0xff] }
 0x188   : > { %v1320_v14 = vpop.f32.mrf.mxu0  ;;  %v1969_v24 = vpop.permute.xlu0 %1968 }
 0x189   : > { %v1349_v7 = vpop.f32.mrf.mxu1  ;;  %vm1973_vm7 = vcmp.eq.s32.totalorder %v1969_v24, 1 }
 0x18a   : > { %v1350_v8 = vadd.f32 %v1349_v7, %v1320_v14  ;;  %v1994_v48 = vpop.permute.xlu1 %1993  ;;  %v1978_v13 = vsel %vm1973_vm7, %v4347_v59, 0.0  ;;  %v4855_v14 = vpack.c.bf16 %v3933_v49, %v4854_v46 }
 0x18b   : > { %vm1998_vm2 = vcmp.eq.s32.totalorder %v1994_v48, 1  ;;  %v2045_v41 = vpop.permute.xlu2 %2044  ;;  %v1982_v43 = vadd.f32 %v1978_v13, %v1925_v58 }
 0x18c   : > { %2856 = vmatmul.msk.bf16.gmra.mxu0 %vm4041_vm14, %v4811_v20  ;;  %2864 = vmatmul.msk.bf16.gmra.mxu1 %vm4053_vm10, %v4811_v20  ;;  %v2002_v40 = vsel %vm1998_vm2, %v4347_v59, 0.0  ;;  %vm2053_vm12 = vcmp.eq.s32.totalorder %v2045_v41, 1 }
 0x18d   : > { %2872 = vmatmul.msk.bf16.gmra.mxu2 %vm4065_vm1, %v4811_v20  ;;  %v2006_v60 = vadd.f32 %v2002_v40, %v4342_v54  ;;  %v2057_v19 = vsel %vm2053_vm12, %v4409_v45, 0.0  ;;  %vm2029_vm12 = vcmp.eq.s32.totalorder %v4398_v2, 1  ;;  %v4864_v2 = vmov 3  }
 0x18e   : > { %2877 = vmatmul.msk.bf16.gmra.mxu3 %vm1282_vm6, %v4851_v39  ;;  %v2061_v31 = vadd.f32 %v2057_v19, %v2004_v51 }
 0x190   : > { %v1378_v11 = vpop.f32.mrf.mxu2  ;;  %v1322_v27 = vpop.f32.mrf.mxu0 }
 0x191   : > { %v1379_v32 = vadd.f32 %v1378_v11, %v1350_v8  ;;  %v1407_v5 = vpop.f32.mrf.mxu3  ;;  %v1351_v55 = vpop.f32.mrf.mxu1 }
 0x192   : > { %v1352_v29 = vadd.f32 %v1351_v55, %v1322_v27 }
 0x193   : > { %v4427_v54 = vadd.f32 %v1407_v5, %v1379_v32  ;;  %v4429_v37 = vpop.permute.xlu1 %2019  ;;  %v2051_v36 = vpop.permute.xlu2 %2050 }
 0x194   : > { %4852 = vst [vmem:[#allocation10_spill] sm:$0xff] %v4429_v37  ;;  %vm2055_vm1 = vcmp.eq.s32.totalorder %v2051_v36, 1  ;;  %v2026_v57 = vpop.permute.xlu0 %2025 }
 0x195   : > { %v2059_v25 = vsel %vm2055_vm1, %v4409_v45, 0.0  ;;  %vm2030_vm14 = vcmp.eq.s32.totalorder %v2026_v57, 1 }
 0x196   : > { %v2063_v51 = vadd.f32 %v2059_v25, %v2006_v60  ;;  %v2035_v33 = vsel %vm2030_vm14, %v4409_v45, 0.0 }
 0x197   : > { %v4434_v1 = vadd.f32 %v2035_v33, %v1982_v43 }
 0x198   : > { %v1380_v44 = vpop.f32.mrf.mxu2 }
 0x199   : > { %v1325_v26 = vpop.f32.mrf.mxu0  ;;  %4853 = vst [vmem:[#allocation11_spill] sm:$0xff] %v4434_v1  ;;  %v1381_v56 = vadd.f32 %v1380_v44, %v1352_v29  ;;  %v1409_v38 = vpop.f32.mrf.mxu3 }
 0x19a   : > { %v1354_v58 = vpop.f32.mrf.mxu1 }
 0x19b   : > { %v1355_v28 = vadd.f32 %v1354_v58, %v1325_v26  ;;  %v4436_v3 = vadd.f32 %v1409_v38, %v1381_v56 }
 0x19c   : > { %2858 = vmatmul.msk.bf16.gmra.mxu0 %vm4078_vm13, %v4811_v20  ;;  %2866 = vmatmul.msk.bf16.gmra.mxu1 %vm4092_vm15, %v4811_v20  ;;  %v2042_v9 = vpop.permute.xlu1 %2041  ;;  %v4444_v42 = vpop.permute.xlu2 %2079 }
 0x19d   : > { %2874 = vmatmul.msk.bf16.gmra.mxu2 %vm4123_vm5, %v4811_v20  ;;  %vm2052_vm10 = vcmp.eq.s32.totalorder %v2042_v9, 1  ;;  %v4457_v20 = vperm.slane %v3758_v15, 6  ;;  %vm2086_vm7 = vcmp.eq.s32.totalorder %v4444_v42, 1 }
 0x19e   : > { %2878 = vmatmul.msk.bf16.gmra.mxu3 %vm1282_vm6, %v4855_v14  ;;  %v2056_v6 = vsel %vm2052_vm10, %v4409_v45, 0.0 }
 0x19f   : > { %v2060_v7 = vadd.f32 %v2056_v6, %v2003_v18 }
 0x1a0   : > { %v1383_v8 = vpop.f32.mrf.mxu2 }
 0x1a1   : > { %v1327_v48 = vpop.f32.mrf.mxu0  ;;  %v1384_v23 = vadd.f32 %v1383_v8, %v1355_v28  ;;  %v1412_v41 = vpop.f32.mrf.mxu3 }
 0x1a2   : > { %v1356_v24 = vpop.f32.mrf.mxu1 }
 0x1a3   : > { %v1357_v40 = vadd.f32 %v1356_v24, %v1327_v48  ;;  %v4454_v60 = vadd.f32 %v1412_v41, %v1384_v23 }
 0x1a4   : > { %v2048_v19 = vpop.permute.xlu1 %2047 }
 0x1a5   : > { %vm2054_vm13 = vcmp.eq.s32.totalorder %v2048_v19, 1  ;;  %v2102_v30 = vpop.permute.xlu2 %2101 }
 0x1a6   : > { %v2058_v49 = vsel %vm2054_vm13, %v4409_v45, 0.0  ;;  %vm2110_vm15 = vcmp.eq.s32.totalorder %v2102_v30, 1  ;;  %vm2178_vm13 = vcmask 261120  }
 0x1a7   : > { %v2062_v13 = vadd.f32 %v2058_v49, %v2005_v10  ;;  %v2114_v18 = vsel %vm2110_vm15, %v4457_v20, 0.0  ;;  %vm2199_vm15 = vcmask 523520  }
 0x1a8   : > { %v1385_v39 = vpop.f32.mrf.mxu2  ;;  %v4461_v62 = vadd.f32 %v2114_v18, %v2061_v31 }
 0x1a9   : > { %v1426_v43 = vpop.f32.mrf.mxu0  ;;  %v1386_v11 = vadd.f32 %v1385_v39, %v1357_v40  ;;  %v1414_v27 = vpop.f32.mrf.mxu3  ;;  %v2115_v39 = vsel %vm2111_vm9, %v4457_v20, 0.0 }
 0x1aa   : > { %4856 = vst [vmem:[#allocation5_spill] sm:$0xff] %v4461_v62  ;;  %v1455_v32 = vpop.f32.mrf.mxu1 }
 0x1ab   : > { %v4463_v5 = vadd.f32 %v1414_v27, %v1386_v11  ;;  %v4495_v11 = vadd.f32 %v2115_v39, %v2062_v13  ;;  %v1427_v27 = vadd.f32 %v1426_v43, %v4243_v16 }
 0x1ad   : > { %v4465_v55 = vpop.permute.xlu1 %2076  ;;  %4860 = vst [vmem:[#allocation15_spill] sm:$0xff] %v4495_v11 }
 0x1ae   : > { %4857 = vst [vmem:[#allocation12_spill] sm:$0xff] %v4465_v55  ;;  %v2131_v35 = vpop.permute.xlu2 %2130 }
 0x1af   : > { %vm2141_vm2 = vcmp.eq.s32.totalorder %v2131_v35, 1 }
 0x1b0   : > { %v1484_v15 = vpop.f32.mrf.mxu2 }
 0x1b1   : > { %v1428_v29 = vpop.f32.mrf.mxu0  ;;  %v1513_v36 = vpop.f32.mrf.mxu3 }
 0x1b2   : > { %v1457_v25 = vpop.f32.mrf.mxu1  ;;  %v1429_v62 = vadd.f32 %v1428_v29, %v4266_v50 }
 0x1b4   : > { %v1458_v16 = vadd.f32 %v1457_v25, %v1429_v62 }
 0x1b6   : > { %v2099_v57 = vpop.permute.xlu1 %2098 }
 0x1b7   : > { %vm2109_vm5 = vcmp.eq.s32.totalorder %v2099_v57, 1 }
 0x1b8   : > { %v1486_v10 = vpop.f32.mrf.mxu2  ;;  %v2113_v44 = vsel %vm2109_vm5, %v4457_v20, 0.0 }
 0x1b9   : > { %v1431_v33 = vpop.f32.mrf.mxu0  ;;  %v1515_v26 = vpop.f32.mrf.mxu3  ;;  %v4468_v56 = vadd.f32 %v2113_v44, %v2060_v7  ;;  %v1487_v11 = vadd.f32 %v1486_v10, %v1458_v16 }
 0x1ba   : > { %v1460_v31 = vpop.f32.mrf.mxu1  ;;  %v1432_v12 = vadd.f32 %v1431_v33, %v4311_v21 }
 0x1bb   : > { %4858 = vst [vmem:[#allocation13_spill] sm:$0xff] %v4468_v56  ;;  %v1516_v4 = vadd.f32 %v1515_v26, %v1487_v11 }
 0x1bc   : > { %v1461_v50 = vadd.f32 %v1460_v31, %v1432_v12 }
 0x1bf   : > { %v2108_v38 = vpop.permute.xlu1 %2107 }
 0x1c0   : > { %vm2112_vm6 = vcmp.eq.s32.totalorder %v2108_v38, 1  ;;  %v1489_v58 = vpop.f32.mrf.mxu2 }
 0x1c1   : > { %v1433_v28 = vpop.f32.mrf.mxu0  ;;  %v2116_v9 = vsel %vm2112_vm6, %v4457_v20, 0.0  ;;  %v1518_v46 = vpop.f32.mrf.mxu3 }
 0x1c2   : > { %v1462_v14 = vpop.f32.mrf.mxu1  ;;  %v4471_v6 = vadd.f32 %v2116_v9, %v2063_v51  ;;  %v1456_v9 = vadd.f32 %v1455_v32, %v1427_v27  ;;  %v1434_v21 = vadd.f32 %v1433_v28, %v4338_v52 }
 0x1c4   : > { %4859 = vst [vmem:[#allocation14_spill] sm:$0xff] %v4471_v6  ;;  %v1485_v6 = vadd.f32 %v1484_v15, %v1456_v9  ;;  %v1463_v10 = vadd.f32 %v1462_v14, %v1434_v21 }
 0x1c6   : > { %v1514_v34 = vadd.f32 %v1513_v36, %v1485_v6  ;;  %v1490_v36 = vadd.f32 %v1489_v58, %v1461_v50 }
 0x1c8   : > { %v1491_v8 = vpop.f32.mrf.mxu2  ;;  %v1519_v62 = vadd.f32 %v1518_v46, %v1490_v36 }
 0x1c9   : > { %v1436_v48 = vpop.f32.mrf.mxu0  ;;  %v4473_v23 = vpop.f32.mrf.mxu3  ;;  %v1492_v33 = vadd.f32 %v1491_v8, %v1463_v10 }
 0x1ca   : > { %v4475_v41 = vpop.f32.mrf.mxu1  ;;  %v1437_v52 = vadd.f32 %v1436_v48, %v4427_v54 }
 0x1cb   : > { %v1521_v28 = vadd.f32 %v4473_v23, %v1492_v33 }
 0x1cc   : > { %v1466_v11 = vadd.f32 %v4475_v41, %v1437_v52 }
 0x1d0   : > { %v4477_v24 = vpop.f32.mrf.mxu2 }
 0x1d1   : > { %v4479_v7 = vpop.f32.mrf.mxu0  ;;  %v4481_v40 = vpop.f32.mrf.mxu3  ;;  %v1495_v16 = vadd.f32 %v4477_v24, %v1466_v11  ;;  %v4861_v11 = vld [vmem:[#allocation6_spill] sm:$0xff] }
 0x1d2   : > { %v4483_v19 = vpop.f32.mrf.mxu1  ;;  %v1439_v54 = vadd.f32 %v4479_v7, %v4436_v3  ;;  %vm2124_vm0 = vcmp.eq.s32.totalorder %v4861_v11, 7 }
 0x1d4   : > { %v1468_v50 = vadd.f32 %v4483_v19, %v1439_v54 }
 0x1d8   : > { %v4486_v30 = vpop.f32.mrf.mxu2 }
 0x1d9   : > { %v4488_v51 = vpop.f32.mrf.mxu0  ;;  %v4490_v49 = vpop.f32.mrf.mxu3  ;;  %v1497_v36 = vadd.f32 %v4486_v30, %v1468_v50 }
 0x1da   : > { %v4492_v18 = vpop.f32.mrf.mxu1  ;;  %v1442_v3 = vadd.f32 %v4488_v51, %v4454_v60 }
 0x1e0   : > { %v4498_v57 = vpop.f32.mrf.mxu2 }
 0x1e1   : > { %v4500_v44 = vpop.f32.mrf.mxu0  ;;  %v4502_v38 = vpop.f32.mrf.mxu3 }
 0x1e2   : > { %v4504_v17 = vpop.f32.mrf.mxu1  ;;  %v1444_v60 = vadd.f32 %v4500_v44, %v4463_v5 }
 0x1e4   : > { %v1473_v33 = vadd.f32 %v4504_v17, %v1444_v60 }
 0x1e8   : > { %v4507_v56 = vpop.f32.mrf.mxu2 }
 0x1e9   : > { %v1542_v1 = vpop.f32.mrf.mxu0  ;;  %v4509_v13 = vpop.f32.mrf.mxu3 }
 0x1ea   : > { %v1571_v39 = vpop.f32.mrf.mxu1  ;;  %v1543_v43 = vadd.f32 %v1542_v1, %v1514_v34 }
 0x1ec   : > { %v1572_v55 = vadd.f32 %v1571_v39, %v1543_v43 }
 0x1f0   : > { %v1600_v61 = vpop.f32.mrf.mxu2 }
 0x1f1   : > { %v1544_v37 = vpop.f32.mrf.mxu0  ;;  %v1601_v32 = vadd.f32 %v1600_v61, %v1572_v55  ;;  %v1629_v15 = vpop.f32.mrf.mxu3 }
 0x1f2   : > { %v1573_v27 = vpop.f32.mrf.mxu1  ;;  %v1545_v9 = vadd.f32 %v1544_v37, %v1516_v4 }
 0x1f3   : > { %v4512_v29 = vadd.f32 %v1629_v15, %v1601_v32  ;;  %v1524_v32 = vadd.f32 %v4481_v40, %v1495_v16  ;;  %v2074_v16 = vpop.permute.xlu0 %2073 }
 0x1f4   : > { %v1574_v34 = vadd.f32 %v1573_v27, %v1545_v9  ;;  %vm2084_vm3 = vcmp.eq.s32.totalorder %v2074_v16, 1 }
 0x1f5   : > { %1689 = vrot.lane.b32.xlu0 %v4512_v29, %s3138_s28  ;;  %1657 = vrot.lane.b32.xlu1 %v4512_v29, %s3139_s26 }
 0x1f8   : > { %v1602_v1 = vpop.f32.mrf.mxu2 }
 0x1f9   : > { %v1547_v61 = vpop.f32.mrf.mxu0  ;;  %v1603_v55 = vadd.f32 %v1602_v1, %v1574_v34  ;;  %v1631_v12 = vpop.f32.mrf.mxu3  ;;  %v1526_v34 = vadd.f32 %v4490_v49, %v1497_v36  ;;  %v4862_v36 = vld [vmem:[#allocation8_spill] sm:$0xff] }
 0x1fa   : > { %v1576_v25 = vpop.f32.mrf.mxu1  ;;  %v1548_v37 = vadd.f32 %v1547_v61, %v1519_v62  ;;  %v1471_v62 = vadd.f32 %v4492_v18, %v1442_v3 }
 0x1fb   : > { %v4519_v4 = vadd.f32 %v1631_v12, %v1603_v55 }
 0x1fc   : > { %v1577_v26 = vadd.f32 %v1576_v25, %v1548_v37  ;;  %v1500_v12 = vadd.f32 %v4498_v57, %v1471_v62 }
 0x1fd   : > { %1691 = vrot.lane.b32.xlu1 %v4519_v4, %s3138_s28  ;;  %1659 = vrot.lane.b32.xlu2 %v4519_v4, %s3139_s26 }
 0x1fe   : > { %v1529_v10 = vadd.f32 %v4502_v38, %v1500_v12  ;;  %v4867_v12 = vld [vmem:[#allocation7_spill] sm:$0xff] }
 0x200   : > { %v1605_v31 = vpop.f32.mrf.mxu2 }
 0x201   : > { %v1549_v58 = vpop.f32.mrf.mxu0  ;;  %v1606_v46 = vadd.f32 %v1605_v31, %v1577_v26  ;;  %v1634_v6 = vpop.f32.mrf.mxu3  ;;  %v1502_v31 = vadd.f32 %v4507_v56, %v1473_v33  ;;  %v1975_v56 = vsel %vm1970_vm4, %v4347_v59, 0.0 }
 0x202   : > { %v1578_v14 = vpop.f32.mrf.mxu1  ;;  %v1550_v8 = vadd.f32 %v1549_v58, %v1521_v28  ;;  %v1979_v47 = vadd.f32 %v1975_v56, %v4402_v63  ;;  %v3067_v63 = vld [vmem:[%s4715_s2] sm:$0xff] }
 0x203   : > { %v4528_v39 = vadd.f32 %v1634_v6, %v1606_v46  ;;  %v1531_v38 = vadd.f32 %v4509_v13, %v1502_v31 }
 0x204   : > { %v1579_v48 = vadd.f32 %v1578_v14, %v1550_v8  ;;  %v2032_v8 = vsel %vm2027_vm11, %v4409_v45, 0.0 }
 0x205   : > { %1661 = vrot.lane.b32.xlu0 %v4528_v39, %s3139_s26  ;;  %1693 = vrot.lane.b32.xlu2 %v4528_v39, %s3138_s28 }
 0x208   : > { %v1607_v23 = vpop.f32.mrf.mxu2 }
 0x209   : > { %v1552_v43 = vpop.f32.mrf.mxu0  ;;  %v1608_v41 = vadd.f32 %v1607_v23, %v1579_v48  ;;  %v1636_v15 = vpop.f32.mrf.mxu3  ;;  %v2128_v23 = vsel %vm2124_vm0, 1, %v4827_v22 }
 0x20a   : > { %v1581_v27 = vpop.f32.mrf.mxu1  ;;  %v1553_v9 = vadd.f32 %v1552_v43, %v1524_v32  ;;  %v2036_v43 = vadd.f32 %v2032_v8, %v1979_v47 }
 0x20b   : > { %v4539_v24 = vadd.f32 %v1636_v15, %v1608_v41  ;;  %v4589_v41 = vperm.slane %v3067_v63, 7 }
 0x20c   : > { %v1582_v7 = vadd.f32 %v1581_v27, %v1553_v9  ;;  %v2034_v27 = vsel %vm2029_vm12, %v4409_v45, 0.0  ;;  %v2137_v9 = vpop.permute.xlu2 %2136 }
 0x20d   : > { %1695 = vrot.lane.b32.xlu0 %v4539_v24, %s3138_s28  ;;  %1663 = vrot.lane.b32.xlu1 %v4539_v24, %s3139_s26  ;;  %v2146_v15 = vsel %vm2141_vm2, %v4589_v41, 0.0  ;;  %v2038_v3 = vadd.f32 %v2034_v27, %v4862_v36  ;;  %vm2143_vm1 = vcmp.eq.s32.totalorder %v2137_v9, 1  ;;  %vm2241_vm2 = vcmask 1048320  }
 0x210   : > { %v1610_v40 = vpop.f32.mrf.mxu2 }
 0x211   : > { %v1554_v21 = vpop.f32.mrf.mxu0  ;;  %v1611_v19 = vadd.f32 %v1610_v40, %v1582_v7  ;;  %v1639_v1 = vpop.f32.mrf.mxu3  ;;  %v4863_v7 = vld [vmem:[#allocation10_spill] sm:$0xff] }
 0x212   : > { %v1583_v61 = vpop.f32.mrf.mxu1  ;;  %v1555_v55 = vadd.f32 %v1554_v21, %v1526_v34  ;;  %vm2028_vm8 = vcmp.eq.s32.totalorder %v4863_v7, 1  ;;  %v4865_v21 = vld [vmem:[#allocation12_spill] sm:$0xff]  ;;  %v2148_v34 = vsel %vm2143_vm1, %v4589_v41, 0.0 }
 0x213   : > { %v4550_v30 = vadd.f32 %v1639_v1, %v1611_v19  ;;  %v2033_v42 = vsel %vm2028_vm8, %v4409_v45, 0.0  ;;  %vm2085_vm14 = vcmp.eq.s32.totalorder %v4865_v21, 1  ;;  %v2134_v19 = vpop.permute.xlu1 %2133  ;;  %v4866_v1 = vld [vmem:[#allocation9_spill] sm:$0xff] }
 0x214   : > { %v1584_v51 = vadd.f32 %v1583_v61, %v1555_v55  ;;  %v2037_v61 = vadd.f32 %v2033_v42, %v4866_v1  ;;  %v2090_v62 = vsel %vm2085_vm14, %v4457_v20, 0.0  ;;  %vm2142_vm10 = vcmp.eq.s32.totalorder %v2134_v19, 1  ;;  %v4872_v1 = vld [vmem:[#allocation14_spill] sm:$0xff] }
 0x215   : > { %1697 = vrot.lane.b32.xlu1 %v4550_v30, %s3138_s28  ;;  %1665 = vrot.lane.b32.xlu2 %v4550_v30, %s3139_s26  ;;  %v2147_v45 = vsel %vm2142_vm10, %v4589_v41, 0.0 }
 0x216   : > { %v2094_v60 = vadd.f32 %v2090_v62, %v2037_v61 }
 0x218   : > { %v1612_v49 = vpop.f32.mrf.mxu2 }
 0x219   : > { %v1557_v25 = vpop.f32.mrf.mxu0  ;;  %v1613_v18 = vadd.f32 %v1612_v49, %v1584_v51  ;;  %v1641_v37 = vpop.f32.mrf.mxu3  ;;  %v2151_v51 = vadd.f32 %v2147_v45, %v2094_v60 }
 0x21a   : > { %v1558_v57 = vadd.f32 %v1557_v25, %v1529_v10  ;;  %v1586_v26 = vpop.f32.mrf.mxu1  ;;  %v2083_v25 = vpop.permute.xlu0 %2082 }
 0x21b   : > { %v4561_v52 = vadd.f32 %v1641_v37, %v1613_v18  ;;  %vm2087_vm5 = vcmp.eq.s32.totalorder %v2083_v25, 1 }
 0x21c   : > { %v1587_v5 = vadd.f32 %v1586_v26, %v1558_v57 }
 0x21d   : > { %1667 = vrot.lane.b32.xlu0 %v4561_v52, %s3139_s26  ;;  %1699 = vrot.lane.b32.xlu2 %v4561_v52, %s3138_s28 }
 0x220   : > { %v1615_v44 = vpop.f32.mrf.mxu2 }
 0x221   : > { %v1559_v58 = vpop.f32.mrf.mxu0  ;;  %v1616_v17 = vadd.f32 %v1615_v44, %v1587_v5  ;;  %v1644_v28 = vpop.f32.mrf.mxu3 }
 0x222   : > { %v1560_v6 = vadd.f32 %v1559_v58, %v1531_v38  ;;  %v1588_v14 = vpop.f32.mrf.mxu1 }
 0x223   : > { %v4570_v46 = vadd.f32 %v1644_v28, %v1616_v17 }
 0x224   : > { %v1589_v13 = vadd.f32 %v1588_v14, %v1560_v6 }
 0x225   : > { %1701 = vrot.lane.b32.xlu0 %v4570_v46, %s3138_s28  ;;  %1669 = vrot.lane.b32.xlu1 %v4570_v46, %s3139_s26 }
 0x226   : > { %2158 = vperm.xlu2 %3061, %v4303_v0   ;;  %v2089_v0 = vsel %vm2084_vm3, %v4457_v20, 0.0  ;;  %vm2220_vm3 = vcmask 785920  }
 0x227   : > { %v2093_v22 = vadd.f32 %v2089_v0, %v2036_v43  ;;  %v4868_v43 = vld [vmem:[#allocation11_spill] sm:$0xff] }
 0x228   : > { %v1617_v59 = vpop.f32.mrf.mxu2 }
 0x229   : > { %v1618_v54 = vadd.f32 %v1617_v59, %v1589_v13  ;;  %v1646_v48 = vpop.f32.mrf.mxu3  ;;  %v2150_v50 = vadd.f32 %v2146_v15, %v2093_v22  ;;  %v4869_v15 = vld [vmem:[#allocation13_spill] sm:$0xff] }
 0x22b   : > { %v4583_v32 = vadd.f32 %v1646_v48, %v1618_v54 }
 0x22d   : > { %2139 = vperm.xlu0 %3057, %v2128_v23   ;;  %2155 = vperm.xlu1 %3060, %v4294_v53   ;;  %v2091_v53 = vsel %vm2086_vm7, %v4457_v20, 0.0 }
 0x22e   : > { %1671 = vrot.lane.b32.xlu2 %v4583_v32, %s3139_s26  ;;  %v2095_v40 = vadd.f32 %v2091_v53, %v2038_v3 }
 0x230   : > { %v2152_v55 = vadd.f32 %v2148_v34, %v2095_v40  ;;  %v4870_v40 = vld [vmem:[#allocation5_spill] sm:$0xff]  ;;  %v4871_v34 = vld [vmem:[#allocation15_spill] sm:$0xff] }
 0x235   : > { %1703 = vrot.lane.b32.xlu1 %v4583_v32, %s3138_s28  ;;  %2187 = vrot.lane.b32.xlu0 %v2150_v50, %s3140_s30 }
 0x236   : > { %2164 = vperm.xlu2 %3061, %v2128_v23   ;;  %3062 = vset.pattern.permute.xlu0 %v4864_v2 }
 0x23d   : > { %2161 = vperm.xlu1 %3060, %v4867_v12  }
 0x23e   : > { %2191 = vrot.lane.b32.xlu2 %v2152_v55, %s3140_s30 }
 0x245   : > { %2189 = vrot.lane.b32.xlu1 %v2151_v51, %s3140_s30 }
 0x257   : > { %v1660_v49 = vpop.permute.xlu2 %1659 }
 0x258   : > { %v1682_v26 = vadd.f32 %v1660_v49, %v4519_v4 }
 0x25f   : > { %v1694_v10 = vpop.permute.xlu2 %1693 }
 0x267   : > { %v1658_v18 = vpop.permute.xlu1 %1657  ;;  %v1690_v33 = vpop.permute.xlu0 %1689 }
 0x268   : > { %v1681_v37 = vadd.f32 %v1658_v18, %v4512_v29 }
 0x26a   : > { %v1713_v57 = vadd.f32 %v1690_v33, %v1681_v37 }
 0x26c   : > { %2179 = vst.msk [vmem:[%s4618_s6] sm:$0xff] %vm2178_vm13, %v1713_v57 }
 0x26f   : > { %v1692_v31 = vpop.permute.xlu1 %1691  ;;  %v1666_v5 = vpop.permute.xlu2 %1665 }
 0x270   : > { %v1714_v44 = vadd.f32 %v1692_v31, %v1682_v26  ;;  %v1685_v4 = vadd.f32 %v1666_v5, %v4550_v30 }
 0x272   : > { %2180 = vst.msk [vmem:[%s4618_s6 + $0x8] sm:$0xff] %vm2178_vm13, %v1714_v44 }
 0x277   : > { %v1662_v58 = vpop.permute.xlu0 %1661  ;;  %v1700_v29 = vpop.permute.xlu2 %1699 }
 0x278   : > { %v1683_v38 = vadd.f32 %v1662_v58, %v4528_v39 }
 0x27a   : > { %v1715_v17 = vadd.f32 %v1694_v10, %v1683_v38 }
 0x27c   : > { %2181 = vst.msk [vmem:[%s4618_s6 + $0x10] sm:$0xff] %vm2178_vm13, %v1715_v17 }
 0x27f   : > { %v1664_v28 = vpop.permute.xlu1 %1663  ;;  %v1696_v14 = vpop.permute.xlu0 %1695 }
 0x280   : > { %v1684_v6 = vadd.f32 %v1664_v28, %v4539_v24  ;;  %v2159_v56 = vpop.permute.xlu2 %2158  ;;  %v2092_v24 = vsel %vm2087_vm5, %v4457_v20, 0.0 }
 0x281   : > { %v2096_v30 = vadd.f32 %v2092_v24, %v4868_v43  ;;  %vm2167_vm4 = vcmp.eq.s32.totalorder %v2159_v56, 1 }
 0x282   : > { %v1716_v47 = vadd.f32 %v1696_v14, %v1684_v6 }
 0x284   : > { %2182 = vst.msk [vmem:[%s4618_s6 + $0x18] sm:$0xff] %vm2178_vm13, %v1716_v47 }
 0x287   : > { %v1698_v13 = vpop.permute.xlu1 %1697 }
 0x288   : > { %v1717_v11 = vadd.f32 %v1698_v13, %v1685_v4  ;;  %v1672_v8 = vpop.permute.xlu2 %1671 }
 0x289   : > { %v1688_v20 = vadd.f32 %v1672_v8, %v4583_v32 }
 0x28a   : > { %2208 = vrot.lane.b32.xlu1 %v1717_v11, %s3138_s28 }
 0x28f   : > { %v1668_v39 = vpop.permute.xlu0 %1667 }
 0x290   : > { %v2165_v16 = vpop.permute.xlu2 %2164  ;;  %v1686_v50 = vadd.f32 %v1668_v39, %v4561_v52  ;;  %v2171_v52 = vsel %vm2167_vm4, %v4589_v41, 0.0 }
 0x291   : > { %vm2169_vm11 = vcmp.eq.s32.totalorder %v2165_v16, 1  ;;  %v2175_v21 = vadd.f32 %v2171_v52, %v4870_v40 }
 0x292   : > { %v1718_v53 = vadd.f32 %v1700_v29, %v1686_v50  ;;  %v2173_v32 = vsel %vm2169_vm11, %v4589_v41, 0.0 }
 0x293   : > { %v2177_v61 = vadd.f32 %v2173_v32, %v4872_v1 }
 0x297   : > { %v1702_v59 = vpop.permute.xlu0 %1701  ;;  %v1670_v35 = vpop.permute.xlu1 %1669 }
 0x298   : > { %v2192_v54 = vpop.permute.xlu2 %2191  ;;  %v1687_v9 = vadd.f32 %v1670_v35, %v4570_v46 }
 0x299   : > { %2202 = vst.msk [vmem:[%s4618_s6 + $0x10] sm:$0xff] %vm2199_vm15, %v2192_v54 }
 0x29a   : > { %v1719_v2 = vadd.f32 %v1702_v59, %v1687_v9 }
 0x29f   : > { %v2140_v48 = vpop.permute.xlu0 %2139  ;;  %v2156_v23 = vpop.permute.xlu1 %2155 }
 0x2a0   : > { %vm2144_vm6 = vcmp.eq.s32.totalorder %v2140_v48, 1  ;;  %vm2166_vm9 = vcmp.eq.s32.totalorder %v2156_v23, 1 }
 0x2a1   : > { %v2149_v0 = vsel %vm2144_vm6, %v4589_v41, 0.0  ;;  %v2170_v63 = vsel %vm2166_vm9, %v4589_v41, 0.0 }
 0x2a2   : > { %v2153_v22 = vadd.f32 %v2149_v0, %v2096_v30  ;;  %v2174_v27 = vadd.f32 %v2170_v63, %v4869_v15 }
 0x2a4   : > { %2193 = vrot.lane.b32.xlu0 %v2153_v22, %s3140_s30  ;;  %2229 = vrot.lane.b32.xlu2 %v2174_v27, %s3139_s26 }
 0x2a7   : > { %v1704_v36 = vpop.permute.xlu1 %1703  ;;  %v2188_v3 = vpop.permute.xlu0 %2187 }
 0x2a8   : > { %v1720_v7 = vadd.f32 %v1704_v36, %v1688_v20  ;;  %2200 = vst.msk [vmem:[%s4618_s6] sm:$0xff] %vm2199_vm15, %v2188_v3 }
 0x2aa   : > { %2214 = vrot.lane.b32.xlu1 %v1720_v7, %s3138_s28 }
 0x2ac   : > { %2212 = vrot.lane.b32.xlu0 %v1719_v2, %s3138_s28  ;;  %2210 = vrot.lane.b32.xlu2 %v1718_v53, %s3138_s28  ;;  %s3088_s28 = scalar_lea.hbm %s4716_s3, 64 }
 0x2ad   : > { %p3090_p1 = scmp.lt.s32.totalorder %s3088_s28, %s3084_s20 }
 0x2af   : > { %v2162_v46 = vpop.permute.xlu1 %2161  ;;  %p3091_p2 = por %p3090_p1, %p3089_p0 }
 0x2b0   : > { %vm2168_vm0 = vcmp.eq.s32.totalorder %v2162_v46, 1 }
 0x2b1   : > { %v2172_v42 = vsel %vm2168_vm0, %v4589_v41, 0.0  ;;  %p3092_p3 = pnand %p3091_p2, %p3087_p13 }
 0x2b2   : > { %v2176_v19 = vadd.f32 %v2172_v42, %v4871_v34 }
 0x2b4   : > { %2231 = vrot.lane.b32.xlu0 %v2175_v21, %s3139_s26  ;;  %2233 = vrot.lane.b32.xlu1 %v2176_v19, %s3139_s26 }
 0x2b5   : > { %2235 = vrot.lane.b32.xlu2 %v2177_v61, %s3139_s26 }
 0x2b7   : > { %v2190_v62 = vpop.permute.xlu1 %2189 }
 0x2b8   : > { %2201 = vst.msk [vmem:[%s4618_s6 + $0x8] sm:$0xff] %vm2199_vm15, %v2190_v62 }
 0x2fc   : > { %v2209_v41 = vpop.permute.xlu1 %2208 }
 0x2fd   : > { %2221 = vst.msk [vmem:[%s4618_s6] sm:$0xff] %vm2220_vm3, %v2209_v41 }
 0x2fe   : > { %v2230_v55 = vpop.permute.xlu2 %2229 }
 0x2ff   : > { %2242 = vst.msk [vmem:[%s4618_s6] sm:$0xff] %vm2241_vm2, %v2230_v55 }
 0x306   : > { %v2211_v12 = vpop.permute.xlu2 %2210 }
 0x307   : > { %2222 = vst.msk [vmem:[%s4618_s6 + $0x8] sm:$0xff] %vm2220_vm3, %v2211_v12 }
 0x30f   : > { %v2236_v51 = vpop.permute.xlu2 %2235 }
 0x316   : > { %v2194_v60 = vpop.permute.xlu0 %2193 }
 0x317   : > { %2203 = vst.msk [vmem:[%s4618_s6 + $0x18] sm:$0xff] %vm2199_vm15, %v2194_v60 }
 0x31c   : > { %v2215_v45 = vpop.permute.xlu1 %2214 }
 0x31d   : > { %2224 = vst.msk [vmem:[%s4618_s6 + $0x18] sm:$0xff] %vm2220_vm3, %v2215_v45 }
 0x31e   : > { %2245 = vst.msk [vmem:[%s4618_s6 + $0x18] sm:$0xff] %vm2241_vm2, %v2236_v51  ;;  %v2213_v49 = vpop.permute.xlu0 %2212 }
 0x31f   : > { %2223 = vst.msk [vmem:[%s4618_s6 + $0x10] sm:$0xff] %vm2220_vm3, %v2213_v49 }
 0x326   : > { %v2232_v25 = vpop.permute.xlu0 %2231  ;;  %v2234_v10 = vpop.permute.xlu1 %2233 }
 0x327   : > { %2243 = vst.msk [vmem:[%s4618_s6 + $0x8] sm:$0xff] %vm2241_vm2, %v2232_v25 }
 0x328   : > { %2244 = vst.msk [vmem:[%s4618_s6 + $0x10] sm:$0xff] %vm2241_vm2, %v2234_v10 }
 0x329   : > { %3095 = shalt.err (!%p3092_p3)
}
 0x32a   : > { %s3141_s29 = smov 128   ;;  %s3142_s30 = smov 8  }
 0x32b   : > { %2975 = dma.vmem_to_hbm [thread:$0]  (%p3201_p5), %s2260_s11, 512, %s2262_s17, %s2247_s16, %s3141_s29, %s3141_s29, %s3142_s30  }
 0x32c PF: > { %p2981_p4 = scmp.ge.s32.totalorder %s3130_s15, 2  ;;  %s2276_s4 = sand.u32 1, %s3118_s12  }
 0x32d   : > { %s2277_s5 = scalar_lea.sflag [#allocation3], %s2276_s4 }
 0x32e   : > { %p2978_p7 = pnand %p2981_p4, %p3205_p6 }
 0x330   : > { %p2979_p8 = pneg %p2978_p7 }
 0x332   : > { %3113 = dma.done.wait (%p2979_p8), %s2277_s5, 512  }
 0x333   : > { %3115 = vsyncadd (%p2979_p8), %s2277_s5, 4294966784  ;;  %p13_p9 = scmp.ge.s32.totalorder %s3188_s18, 4   ;;  %s4873_s12 = smov %s3122_s13 }
 0x334   : > { %s4874_s13 = smov %s3126_s14  ;;  %s4875_s14 = smov %s3199_s21 }
 0x335   : > { %s4876_s15 = smov %s3188_s18  ;;  %15 = sbr.rel (!%p13_p9) target bundleno = 3 (0x3), region = 67 }
 0x33a   :  { %2283 = vsyncpa [#allocation3], 1 }
 0x33b   :  { %2285 = vsyncpa [#allocation3 + $0x1], 1 }

</bundles_post_ra>
